<compile_context>
chip_gen: v7x
topology: tpu7x:2x2x1
jax: 0.10.0
libtpu: 0.0.40
codegen_flags: <defaults>
</compile_context>

<pallas_src>
import functools

import jax
import jax.numpy as jnp
import numpy as np
from jax.experimental import pallas as pl
from jax.experimental.pallas import tpu as pltpu  # noqa: F401  (kept for TPU-specific tuning)


def rollout_encoder_kernel(a_seq_ref, s_seq_ref, a_last_ref, r_ref,
                           wa_ref, ws_ref, b_ref,
                           whi_ref, whf_ref, whg_ref, who_ref,
                           wfh_ref, wfa_ref, wfr_ref, bfc_ref,
                           out_ref, *, T, N, H):
    f32 = jnp.float32

    # ---- phase 1: batched input projection for ALL timesteps (off the serial path) ----
    gx = (jnp.dot(a_seq_ref[...], wa_ref[...], preferred_element_type=f32)
          + jnp.dot(s_seq_ref[...], ws_ref[...], preferred_element_type=f32)
          + b_ref[...])                                   # (T*N, 4H), gate order i,f,g,o
    # Slice the four gate blocks ONCE, outside the serial recurrence.
    gx_i = gx[:, 0 * H:1 * H]
    gx_f = gx[:, 1 * H:2 * H]
    gx_g = gx[:, 2 * H:3 * H]
    gx_o = gx[:, 3 * H:4 * H]

    whi = whi_ref[...]
    whf = whf_ref[...]
    whg = whg_ref[...]
    who = who_ref[...]

    def sigm(z):
        # tanh-form sigmoid: goes to the EUP (free slot next to the matmuls),
        # avoids a VPU divide on the serial per-step path, and is numerically stable.
        return 0.5 * jnp.tanh(0.5 * z) + 0.5

    # ---- phase 2: T-step LSTM recurrence, fully unrolled (T static & small) ----
    h = jnp.zeros((N, H), f32)
    c = jnp.zeros((N, H), f32)
    for t in range(T):
        r0, r1 = t * N, (t + 1) * N            # sublane-aligned row block of gx_*
        i_g = sigm(gx_i[r0:r1] + jnp.dot(h, whi, preferred_element_type=f32))
        f_g = sigm(gx_f[r0:r1] + jnp.dot(h, whf, preferred_element_type=f32))
        g_g = jnp.tanh(gx_g[r0:r1] + jnp.dot(h, whg, preferred_element_type=f32))
        o_g = sigm(gx_o[r0:r1] + jnp.dot(h, who, preferred_element_type=f32))
        c = f_g * c + i_g * g_g
        h = o_g * jnp.tanh(c)

    # ---- phase 3: fused Linear + ReLU over cat([h, last_action, reward]) ----
    acc = (bfc_ref[...]
           + jnp.dot(a_last_ref[...], wfa_ref[...], preferred_element_type=f32)
           + jnp.dot(r_ref[...], wfr_ref[...], preferred_element_type=f32))
    # Per-trajectory h block times matching fc-weight rows (avoids an in-kernel
    # (N, H) -> (1, N*H) relayout/reshape); N is small & static.
    for n in range(N):
        acc = acc + jnp.dot(h[n:n + 1, :], wfh_ref[n * H:(n + 1) * H, :],
                            preferred_element_type=f32)
    out_ref[...] = jnp.maximum(acc, 0.0)       # activation_function='relu', lane-dense store


def prepare_rollout_encoder_params(params, num_traj, action_size, latent_size):
    """One-time weight preprocessing (hoisted out of the per-call path)."""
    f32 = jnp.float32
    wih = params["wih"].astype(f32)            # (4H, A+L), gate rows [i; f; g; o]
    whh = params["whh"].astype(f32)            # (4H, H)
    H = whh.shape[1]
    A, L, N = action_size, latent_size, num_traj

    wih_t = wih.T                              # (A+L, 4H)
    wa = wih_t[:A, :]                          # (A, 4H)   action part of Wih
    ws = wih_t[A:, :]                          # (L, 4H)   state  part of Wih
    b = (params["bih"] + params["bhh"]).astype(f32).reshape(1, 4 * H)

    # Per-gate recurrent weights, pre-transposed: gate = h @ wh_g
    wh = [whh[g * H:(g + 1) * H, :].T for g in range(4)]        # each (H, H)

    wfc = params["wfc"].astype(f32)            # (hidden, N*(H+A+1))
    bfc = params["bfc"].astype(f32)
    hidden = wfc.shape[0]
    K = H + A + 1
    kp = ((hidden + 127) // 128) * 128         # lane-dense fc output width
    w_t = wfc.T.reshape(N, K, hidden)          # per-trajectory blocking [h | a | r]
    pad = ((0, 0), (0, kp - hidden))
    wfc_h = jnp.pad(w_t[:, :H, :].reshape(N * H, hidden), pad)          # (N*H, kp)
    wfc_a = jnp.pad(w_t[:, H:H + A, :].reshape(N * A, hidden), pad)     # (N*A, kp)
    wfc_r = jnp.pad(w_t[:, H + A, :], pad)                              # (N,   kp)
    bfc_p = jnp.pad(bfc.reshape(1, hidden), pad)                        # (1,   kp)

    return {
        "wa": wa, "ws": ws, "b": b,
        "wh_i": wh[0], "wh_f": wh[1], "wh_g": wh[2], "wh_o": wh[3],
        "wfc_h": wfc_h, "wfc_a": wfc_a, "wfc_r": wfc_r, "bfc": bfc_p,
        "H": int(H), "hidden": int(hidden),
    }


def rollout_encoder_forward(prep, imagined_reward, imagined_actions, imagined_states):
    # imagined_actions: (T+1, N, A), imagined_states: (T, N, L), imagined_reward: (N,)
    T, N, L = imagined_states.shape
    A = imagined_actions.shape[-1]
    H = prep["H"]
    hidden = prep["hidden"]
    kp = prep["bfc"].shape[1]

    # Cheap activation reshapes only (no concat / no weight work per call).
    a_seq = imagined_actions[:-1].reshape(T * N, A).astype(jnp.float32)
    s_seq = imagined_states.reshape(T * N, L).astype(jnp.float32)
    a_last = imagined_actions[-1].reshape(1, N * A).astype(jnp.float32)
    r = imagined_reward.reshape(1, N).astype(jnp.float32)

    args = (a_seq, s_seq, a_last, r,
            prep["wa"], prep["ws"], prep["b"],
            prep["wh_i"], prep["wh_f"], prep["wh_g"], prep["wh_o"],
            prep["wfc_h"], prep["wfc_a"], prep["wfc_r"], prep["bfc"])

    out_padded = pl.pallas_call(
        functools.partial(rollout_encoder_kernel, T=T, N=N, H=H),
        out_shape=jax.ShapeDtypeStruct((1, kp), jnp.float32),
        in_specs=[pl.BlockSpec(a.shape, lambda: (0, 0)) for a in args],
        out_specs=pl.BlockSpec((1, kp), lambda: (0, 0)),
    )(*args)
    return out_padded[:, :hidden]


def rollout_encoder_reference(params, imagined_reward, imagined_actions, imagined_states):
    """Pure-JAX reference mirroring the PyTorch forward."""
    H = params["whh"].shape[0] // 4
    N = imagined_states.shape[1]
    x = jnp.concatenate([imagined_actions[:-1], imagined_states], axis=-1)
    h = jnp.zeros((N, H), jnp.float32)
    c = jnp.zeros((N, H), jnp.float32)
    for t in range(x.shape[0]):
        gates = (x[t] @ params["wih"].T + params["bih"]
                 + h @ params["whh"].T + params["bhh"])
        i_g = jax.nn.sigmoid(gates[:, 0 * H:1 * H])
        f_g = jax.nn.sigmoid(gates[:, 1 * H:2 * H])
        g_g = jnp.tanh(gates[:, 2 * H:3 * H])
        o_g = jax.nn.sigmoid(gates[:, 3 * H:4 * H])
        c = f_g * c + i_g * g_g
        h = o_g * jnp.tanh(c)
    emb = jnp.concatenate([h, imagined_actions[-1], imagined_reward.reshape(-1, 1)],
                          axis=-1).reshape(1, -1)
    return jax.nn.relu(emb @ params["wfc"].T + params["bfc"])


if __name__ == "__main__":
    # Small shapes consistent with the module.
    latent_size = 16      # L
    action_size = 4       # A
    hidden_size = 32      # H (also output hidden of fc)
    num_traj = 8          # N == num_sample_trajectories
    T = 8                 # LSTM sequence length (actions have T+1 steps)

    key = jax.random.PRNGKey(0)
    k = jax.random.split(key, 9)
    D = action_size + latent_size
    fc_in = num_traj * (hidden_size + action_size + 1)

    params = {
        "wih": 0.1 * jax.random.normal(k[0], (4 * hidden_size, D), jnp.float32),
        "whh": 0.1 * jax.random.normal(k[1], (4 * hidden_size, hidden_size), jnp.float32),
        "bih": 0.1 * jax.random.normal(k[2], (4 * hidden_size,), jnp.float32),
        "bhh": 0.1 * jax.random.normal(k[3], (4 * hidden_size,), jnp.float32),
        "wfc": 0.1 * jax.random.normal(k[4], (hidden_size, fc_in), jnp.float32),
        "bfc": 0.1 * jax.random.normal(k[5], (hidden_size,), jnp.float32),
    }

    imagined_reward = jax.random.normal(k[6], (num_traj,), jnp.float32)
    imagined_actions = jax.random.normal(k[7], (T + 1, num_traj, action_size), jnp.float32)
    imagined_states = jax.random.normal(k[8], (T, num_traj, latent_size), jnp.float32)

    # One-time parameter preprocessing (hoisted off the per-call path).
    prep = prepare_rollout_encoder_params(params, num_traj, action_size, latent_size)

    out = rollout_encoder_forward(prep, imagined_reward, imagined_actions, imagined_states)
    out = jax.block_until_ready(out)

    ref = rollout_encoder_reference(params, imagined_reward, imagined_actions, imagined_states)
    np.testing.assert_allclose(np.asarray(out), np.asarray(ref), rtol=1e-4, atol=1e-4)
    assert out.shape == (1, hidden_size)

    print("KERNEL_OK")
</pallas_src>

<mosaic_0001>
module attributes {stable_mosaic.version = 11 : i64} {
  func.func @rollout_encoder_kernel(%arg0: memref<64x4xf32, #tpu.memory_space<vmem>>, %arg1: memref<64x16xf32, #tpu.memory_space<vmem>>, %arg2: memref<1x32xf32, #tpu.memory_space<vmem>>, %arg3: memref<1x8xf32, #tpu.memory_space<vmem>>, %arg4: memref<4x128xf32, #tpu.memory_space<vmem>>, %arg5: memref<16x128xf32, #tpu.memory_space<vmem>>, %arg6: memref<1x128xf32, #tpu.memory_space<vmem>>, %arg7: memref<32x32xf32, #tpu.memory_space<vmem>>, %arg8: memref<32x32xf32, #tpu.memory_space<vmem>>, %arg9: memref<32x32xf32, #tpu.memory_space<vmem>>, %arg10: memref<32x32xf32, #tpu.memory_space<vmem>>, %arg11: memref<256x128xf32, #tpu.memory_space<vmem>>, %arg12: memref<32x128xf32, #tpu.memory_space<vmem>>, %arg13: memref<8x128xf32, #tpu.memory_space<vmem>>, %arg14: memref<1x128xf32, #tpu.memory_space<vmem>>, %arg15: memref<1x128xf32, #tpu.memory_space<vmem>>) attributes {dimension_semantics = [], scalar_prefetch = 0 : i64, scratch_operands = 0 : i64, tpu.core_type = #tpu.core_type<tc>} {
    %c0 = arith.constant 0 : index
    %c0_0 = arith.constant 0 : index
    %0 = vector.load %arg0[%c0, %c0_0] : memref<64x4xf32, #tpu.memory_space<vmem>>, vector<64x4xf32>
    %c0_1 = arith.constant 0 : index
    %c0_2 = arith.constant 0 : index
    %1 = vector.load %arg4[%c0_1, %c0_2] : memref<4x128xf32, #tpu.memory_space<vmem>>, vector<4x128xf32>
    %cst = arith.constant dense<0.000000e+00> : vector<64x128xf32>
    %2 = tpu.matmul %0, %1, %cst {dimension_numbers = #tpu.dot_dimension_numbers<[1], [0], [0], [1], [0, 0, 1, 1], [], []>} : vector<64x4xf32>, vector<4x128xf32>, vector<64x128xf32> -> vector<64x128xf32>
    %c0_3 = arith.constant 0 : index
    %c0_4 = arith.constant 0 : index
    %3 = vector.load %arg1[%c0_3, %c0_4] : memref<64x16xf32, #tpu.memory_space<vmem>>, vector<64x16xf32>
    %c0_5 = arith.constant 0 : index
    %c0_6 = arith.constant 0 : index
    %4 = vector.load %arg5[%c0_5, %c0_6] : memref<16x128xf32, #tpu.memory_space<vmem>>, vector<16x128xf32>
    %cst_7 = arith.constant dense<0.000000e+00> : vector<64x128xf32>
    %5 = tpu.matmul %3, %4, %cst_7 {dimension_numbers = #tpu.dot_dimension_numbers<[1], [0], [0], [1], [0, 0, 1, 1], [], []>} : vector<64x16xf32>, vector<16x128xf32>, vector<64x128xf32> -> vector<64x128xf32>
    %6 = arith.addf %2, %5 : vector<64x128xf32>
    %c0_8 = arith.constant 0 : index
    %c0_9 = arith.constant 0 : index
    %7 = vector.load %arg6[%c0_8, %c0_9] : memref<1x128xf32, #tpu.memory_space<vmem>>, vector<1x128xf32>
    %8 = vector.broadcast %7 : vector<1x128xf32> to vector<64x128xf32>
    %9 = arith.addf %6, %8 : vector<64x128xf32>
    %10 = vector.extract_strided_slice %9 {offsets = [0, 0], sizes = [64, 32], strides = [1, 1]} : vector<64x128xf32> to vector<64x32xf32>
    %11 = vector.extract_strided_slice %9 {offsets = [0, 32], sizes = [64, 32], strides = [1, 1]} : vector<64x128xf32> to vector<64x32xf32>
    %12 = vector.extract_strided_slice %9 {offsets = [0, 64], sizes = [64, 32], strides = [1, 1]} : vector<64x128xf32> to vector<64x32xf32>
    %13 = vector.extract_strided_slice %9 {offsets = [0, 96], sizes = [64, 32], strides = [1, 1]} : vector<64x128xf32> to vector<64x32xf32>
    %c0_10 = arith.constant 0 : index
    %c0_11 = arith.constant 0 : index
    %14 = vector.load %arg7[%c0_10, %c0_11] : memref<32x32xf32, #tpu.memory_space<vmem>>, vector<32x32xf32>
    %c0_12 = arith.constant 0 : index
    %c0_13 = arith.constant 0 : index
    %15 = vector.load %arg8[%c0_12, %c0_13] : memref<32x32xf32, #tpu.memory_space<vmem>>, vector<32x32xf32>
    %c0_14 = arith.constant 0 : index
    %c0_15 = arith.constant 0 : index
    %16 = vector.load %arg9[%c0_14, %c0_15] : memref<32x32xf32, #tpu.memory_space<vmem>>, vector<32x32xf32>
    %c0_16 = arith.constant 0 : index
    %c0_17 = arith.constant 0 : index
    %17 = vector.load %arg10[%c0_16, %c0_17] : memref<32x32xf32, #tpu.memory_space<vmem>>, vector<32x32xf32>
    %cst_18 = arith.constant 0.000000e+00 : f32
    %18 = vector.broadcast %cst_18 : f32 to vector<8x32xf32>
    %cst_19 = arith.constant 0.000000e+00 : f32
    %19 = vector.broadcast %cst_19 : f32 to vector<8x32xf32>
    %20 = vector.extract_strided_slice %10 {offsets = [0, 0], sizes = [8, 32], strides = [1, 1]} : vector<64x32xf32> to vector<8x32xf32>
    %cst_20 = arith.constant dense<0.000000e+00> : vector<8x32xf32>
    %21 = tpu.matmul %18, %14, %cst_20 {dimension_numbers = #tpu.dot_dimension_numbers<[1], [0], [0], [1], [0, 0, 1, 1], [], []>} : vector<8x32xf32>, vector<32x32xf32>, vector<8x32xf32> -> vector<8x32xf32>
    %22 = arith.addf %20, %21 : vector<8x32xf32>
    %cst_21 = arith.constant 5.000000e-01 : f32
    %23 = vector.broadcast %cst_21 : f32 to vector<8x32xf32>
    %24 = arith.mulf %23, %22 : vector<8x32xf32>
    %25 = math.tanh %24 : vector<8x32xf32>
    %cst_22 = arith.constant 5.000000e-01 : f32
    %26 = vector.broadcast %cst_22 : f32 to vector<8x32xf32>
    %27 = arith.mulf %26, %25 : vector<8x32xf32>
    %cst_23 = arith.constant 5.000000e-01 : f32
    %28 = vector.broadcast %cst_23 : f32 to vector<8x32xf32>
    %29 = arith.addf %27, %28 : vector<8x32xf32>
    %30 = vector.extract_strided_slice %11 {offsets = [0, 0], sizes = [8, 32], strides = [1, 1]} : vector<64x32xf32> to vector<8x32xf32>
    %cst_24 = arith.constant dense<0.000000e+00> : vector<8x32xf32>
    %31 = tpu.matmul %18, %15, %cst_24 {dimension_numbers = #tpu.dot_dimension_numbers<[1], [0], [0], [1], [0, 0, 1, 1], [], []>} : vector<8x32xf32>, vector<32x32xf32>, vector<8x32xf32> -> vector<8x32xf32>
    %32 = arith.addf %30, %31 : vector<8x32xf32>
    %cst_25 = arith.constant 5.000000e-01 : f32
    %33 = vector.broadcast %cst_25 : f32 to vector<8x32xf32>
    %34 = arith.mulf %33, %32 : vector<8x32xf32>
    %35 = math.tanh %34 : vector<8x32xf32>
    %cst_26 = arith.constant 5.000000e-01 : f32
    %36 = vector.broadcast %cst_26 : f32 to vector<8x32xf32>
    %37 = arith.mulf %36, %35 : vector<8x32xf32>
    %cst_27 = arith.constant 5.000000e-01 : f32
    %38 = vector.broadcast %cst_27 : f32 to vector<8x32xf32>
    %39 = arith.addf %37, %38 : vector<8x32xf32>
    %40 = vector.extract_strided_slice %12 {offsets = [0, 0], sizes = [8, 32], strides = [1, 1]} : vector<64x32xf32> to vector<8x32xf32>
    %cst_28 = arith.constant dense<0.000000e+00> : vector<8x32xf32>
    %41 = tpu.matmul %18, %16, %cst_28 {dimension_numbers = #tpu.dot_dimension_numbers<[1], [0], [0], [1], [0, 0, 1, 1], [], []>} : vector<8x32xf32>, vector<32x32xf32>, vector<8x32xf32> -> vector<8x32xf32>
    %42 = arith.addf %40, %41 : vector<8x32xf32>
    %43 = math.tanh %42 : vector<8x32xf32>
    %44 = vector.extract_strided_slice %13 {offsets = [0, 0], sizes = [8, 32], strides = [1, 1]} : vector<64x32xf32> to vector<8x32xf32>
    %cst_29 = arith.constant dense<0.000000e+00> : vector<8x32xf32>
    %45 = tpu.matmul %18, %17, %cst_29 {dimension_numbers = #tpu.dot_dimension_numbers<[1], [0], [0], [1], [0, 0, 1, 1], [], []>} : vector<8x32xf32>, vector<32x32xf32>, vector<8x32xf32> -> vector<8x32xf32>
    %46 = arith.addf %44, %45 : vector<8x32xf32>
    %cst_30 = arith.constant 5.000000e-01 : f32
    %47 = vector.broadcast %cst_30 : f32 to vector<8x32xf32>
    %48 = arith.mulf %47, %46 : vector<8x32xf32>
    %49 = math.tanh %48 : vector<8x32xf32>
    %cst_31 = arith.constant 5.000000e-01 : f32
    %50 = vector.broadcast %cst_31 : f32 to vector<8x32xf32>
    %51 = arith.mulf %50, %49 : vector<8x32xf32>
    %cst_32 = arith.constant 5.000000e-01 : f32
    %52 = vector.broadcast %cst_32 : f32 to vector<8x32xf32>
    %53 = arith.addf %51, %52 : vector<8x32xf32>
    %54 = arith.mulf %39, %19 : vector<8x32xf32>
    %55 = arith.mulf %29, %43 : vector<8x32xf32>
    %56 = arith.addf %54, %55 : vector<8x32xf32>
    %57 = math.tanh %56 : vector<8x32xf32>
    %58 = arith.mulf %53, %57 : vector<8x32xf32>
    %59 = vector.extract_strided_slice %10 {offsets = [8, 0], sizes = [8, 32], strides = [1, 1]} : vector<64x32xf32> to vector<8x32xf32>
    %cst_33 = arith.constant dense<0.000000e+00> : vector<8x32xf32>
    %60 = tpu.matmul %58, %14, %cst_33 {dimension_numbers = #tpu.dot_dimension_numbers<[1], [0], [0], [1], [0, 0, 1, 1], [], []>} : vector<8x32xf32>, vector<32x32xf32>, vector<8x32xf32> -> vector<8x32xf32>
    %61 = arith.addf %59, %60 : vector<8x32xf32>
    %cst_34 = arith.constant 5.000000e-01 : f32
    %62 = vector.broadcast %cst_34 : f32 to vector<8x32xf32>
    %63 = arith.mulf %62, %61 : vector<8x32xf32>
    %64 = math.tanh %63 : vector<8x32xf32>
    %cst_35 = arith.constant 5.000000e-01 : f32
    %65 = vector.broadcast %cst_35 : f32 to vector<8x32xf32>
    %66 = arith.mulf %65, %64 : vector<8x32xf32>
    %cst_36 = arith.constant 5.000000e-01 : f32
    %67 = vector.broadcast %cst_36 : f32 to vector<8x32xf32>
    %68 = arith.addf %66, %67 : vector<8x32xf32>
    %69 = vector.extract_strided_slice %11 {offsets = [8, 0], sizes = [8, 32], strides = [1, 1]} : vector<64x32xf32> to vector<8x32xf32>
    %cst_37 = arith.constant dense<0.000000e+00> : vector<8x32xf32>
    %70 = tpu.matmul %58, %15, %cst_37 {dimension_numbers = #tpu.dot_dimension_numbers<[1], [0], [0], [1], [0, 0, 1, 1], [], []>} : vector<8x32xf32>, vector<32x32xf32>, vector<8x32xf32> -> vector<8x32xf32>
    %71 = arith.addf %69, %70 : vector<8x32xf32>
    %cst_38 = arith.constant 5.000000e-01 : f32
    %72 = vector.broadcast %cst_38 : f32 to vector<8x32xf32>
    %73 = arith.mulf %72, %71 : vector<8x32xf32>
    %74 = math.tanh %73 : vector<8x32xf32>
    %cst_39 = arith.constant 5.000000e-01 : f32
    %75 = vector.broadcast %cst_39 : f32 to vector<8x32xf32>
    %76 = arith.mulf %75, %74 : vector<8x32xf32>
    %cst_40 = arith.constant 5.000000e-01 : f32
    %77 = vector.broadcast %cst_40 : f32 to vector<8x32xf32>
    %78 = arith.addf %76, %77 : vector<8x32xf32>
    %79 = vector.extract_strided_slice %12 {offsets = [8, 0], sizes = [8, 32], strides = [1, 1]} : vector<64x32xf32> to vector<8x32xf32>
    %cst_41 = arith.constant dense<0.000000e+00> : vector<8x32xf32>
    %80 = tpu.matmul %58, %16, %cst_41 {dimension_numbers = #tpu.dot_dimension_numbers<[1], [0], [0], [1], [0, 0, 1, 1], [], []>} : vector<8x32xf32>, vector<32x32xf32>, vector<8x32xf32> -> vector<8x32xf32>
    %81 = arith.addf %79, %80 : vector<8x32xf32>
    %82 = math.tanh %81 : vector<8x32xf32>
    %83 = vector.extract_strided_slice %13 {offsets = [8, 0], sizes = [8, 32], strides = [1, 1]} : vector<64x32xf32> to vector<8x32xf32>
    %cst_42 = arith.constant dense<0.000000e+00> : vector<8x32xf32>
    %84 = tpu.matmul %58, %17, %cst_42 {dimension_numbers = #tpu.dot_dimension_numbers<[1], [0], [0], [1], [0, 0, 1, 1], [], []>} : vector<8x32xf32>, vector<32x32xf32>, vector<8x32xf32> -> vector<8x32xf32>
    %85 = arith.addf %83, %84 : vector<8x32xf32>
    %cst_43 = arith.constant 5.000000e-01 : f32
    %86 = vector.broadcast %cst_43 : f32 to vector<8x32xf32>
    %87 = arith.mulf %86, %85 : vector<8x32xf32>
    %88 = math.tanh %87 : vector<8x32xf32>
    %cst_44 = arith.constant 5.000000e-01 : f32
    %89 = vector.broadcast %cst_44 : f32 to vector<8x32xf32>
    %90 = arith.mulf %89, %88 : vector<8x32xf32>
    %cst_45 = arith.constant 5.000000e-01 : f32
    %91 = vector.broadcast %cst_45 : f32 to vector<8x32xf32>
    %92 = arith.addf %90, %91 : vector<8x32xf32>
    %93 = arith.mulf %78, %56 : vector<8x32xf32>
    %94 = arith.mulf %68, %82 : vector<8x32xf32>
    %95 = arith.addf %93, %94 : vector<8x32xf32>
    %96 = math.tanh %95 : vector<8x32xf32>
    %97 = arith.mulf %92, %96 : vector<8x32xf32>
    %98 = vector.extract_strided_slice %10 {offsets = [16, 0], sizes = [8, 32], strides = [1, 1]} : vector<64x32xf32> to vector<8x32xf32>
    %cst_46 = arith.constant dense<0.000000e+00> : vector<8x32xf32>
    %99 = tpu.matmul %97, %14, %cst_46 {dimension_numbers = #tpu.dot_dimension_numbers<[1], [0], [0], [1], [0, 0, 1, 1], [], []>} : vector<8x32xf32>, vector<32x32xf32>, vector<8x32xf32> -> vector<8x32xf32>
    %100 = arith.addf %98, %99 : vector<8x32xf32>
    %cst_47 = arith.constant 5.000000e-01 : f32
    %101 = vector.broadcast %cst_47 : f32 to vector<8x32xf32>
    %102 = arith.mulf %101, %100 : vector<8x32xf32>
    %103 = math.tanh %102 : vector<8x32xf32>
    %cst_48 = arith.constant 5.000000e-01 : f32
    %104 = vector.broadcast %cst_48 : f32 to vector<8x32xf32>
    %105 = arith.mulf %104, %103 : vector<8x32xf32>
    %cst_49 = arith.constant 5.000000e-01 : f32
    %106 = vector.broadcast %cst_49 : f32 to vector<8x32xf32>
    %107 = arith.addf %105, %106 : vector<8x32xf32>
    %108 = vector.extract_strided_slice %11 {offsets = [16, 0], sizes = [8, 32], strides = [1, 1]} : vector<64x32xf32> to vector<8x32xf32>
    %cst_50 = arith.constant dense<0.000000e+00> : vector<8x32xf32>
    %109 = tpu.matmul %97, %15, %cst_50 {dimension_numbers = #tpu.dot_dimension_numbers<[1], [0], [0], [1], [0, 0, 1, 1], [], []>} : vector<8x32xf32>, vector<32x32xf32>, vector<8x32xf32> -> vector<8x32xf32>
    %110 = arith.addf %108, %109 : vector<8x32xf32>
    %cst_51 = arith.constant 5.000000e-01 : f32
    %111 = vector.broadcast %cst_51 : f32 to vector<8x32xf32>
    %112 = arith.mulf %111, %110 : vector<8x32xf32>
    %113 = math.tanh %112 : vector<8x32xf32>
    %cst_52 = arith.constant 5.000000e-01 : f32
    %114 = vector.broadcast %cst_52 : f32 to vector<8x32xf32>
    %115 = arith.mulf %114, %113 : vector<8x32xf32>
    %cst_53 = arith.constant 5.000000e-01 : f32
    %116 = vector.broadcast %cst_53 : f32 to vector<8x32xf32>
    %117 = arith.addf %115, %116 : vector<8x32xf32>
    %118 = vector.extract_strided_slice %12 {offsets = [16, 0], sizes = [8, 32], strides = [1, 1]} : vector<64x32xf32> to vector<8x32xf32>
    %cst_54 = arith.constant dense<0.000000e+00> : vector<8x32xf32>
    %119 = tpu.matmul %97, %16, %cst_54 {dimension_numbers = #tpu.dot_dimension_numbers<[1], [0], [0], [1], [0, 0, 1, 1], [], []>} : vector<8x32xf32>, vector<32x32xf32>, vector<8x32xf32> -> vector<8x32xf32>
    %120 = arith.addf %118, %119 : vector<8x32xf32>
    %121 = math.tanh %120 : vector<8x32xf32>
    %122 = vector.extract_strided_slice %13 {offsets = [16, 0], sizes = [8, 32], strides = [1, 1]} : vector<64x32xf32> to vector<8x32xf32>
    %cst_55 = arith.constant dense<0.000000e+00> : vector<8x32xf32>
    %123 = tpu.matmul %97, %17, %cst_55 {dimension_numbers = #tpu.dot_dimension_numbers<[1], [0], [0], [1], [0, 0, 1, 1], [], []>} : vector<8x32xf32>, vector<32x32xf32>, vector<8x32xf32> -> vector<8x32xf32>
    %124 = arith.addf %122, %123 : vector<8x32xf32>
    %cst_56 = arith.constant 5.000000e-01 : f32
    %125 = vector.broadcast %cst_56 : f32 to vector<8x32xf32>
    %126 = arith.mulf %125, %124 : vector<8x32xf32>
    %127 = math.tanh %126 : vector<8x32xf32>
    %cst_57 = arith.constant 5.000000e-01 : f32
    %128 = vector.broadcast %cst_57 : f32 to vector<8x32xf32>
    %129 = arith.mulf %128, %127 : vector<8x32xf32>
    %cst_58 = arith.constant 5.000000e-01 : f32
    %130 = vector.broadcast %cst_58 : f32 to vector<8x32xf32>
    %131 = arith.addf %129, %130 : vector<8x32xf32>
    %132 = arith.mulf %117, %95 : vector<8x32xf32>
    %133 = arith.mulf %107, %121 : vector<8x32xf32>
    %134 = arith.addf %132, %133 : vector<8x32xf32>
    %135 = math.tanh %134 : vector<8x32xf32>
    %136 = arith.mulf %131, %135 : vector<8x32xf32>
    %137 = vector.extract_strided_slice %10 {offsets = [24, 0], sizes = [8, 32], strides = [1, 1]} : vector<64x32xf32> to vector<8x32xf32>
    %cst_59 = arith.constant dense<0.000000e+00> : vector<8x32xf32>
    %138 = tpu.matmul %136, %14, %cst_59 {dimension_numbers = #tpu.dot_dimension_numbers<[1], [0], [0], [1], [0, 0, 1, 1], [], []>} : vector<8x32xf32>, vector<32x32xf32>, vector<8x32xf32> -> vector<8x32xf32>
    %139 = arith.addf %137, %138 : vector<8x32xf32>
    %cst_60 = arith.constant 5.000000e-01 : f32
    %140 = vector.broadcast %cst_60 : f32 to vector<8x32xf32>
    %141 = arith.mulf %140, %139 : vector<8x32xf32>
    %142 = math.tanh %141 : vector<8x32xf32>
    %cst_61 = arith.constant 5.000000e-01 : f32
    %143 = vector.broadcast %cst_61 : f32 to vector<8x32xf32>
    %144 = arith.mulf %143, %142 : vector<8x32xf32>
    %cst_62 = arith.constant 5.000000e-01 : f32
    %145 = vector.broadcast %cst_62 : f32 to vector<8x32xf32>
    %146 = arith.addf %144, %145 : vector<8x32xf32>
    %147 = vector.extract_strided_slice %11 {offsets = [24, 0], sizes = [8, 32], strides = [1, 1]} : vector<64x32xf32> to vector<8x32xf32>
    %cst_63 = arith.constant dense<0.000000e+00> : vector<8x32xf32>
    %148 = tpu.matmul %136, %15, %cst_63 {dimension_numbers = #tpu.dot_dimension_numbers<[1], [0], [0], [1], [0, 0, 1, 1], [], []>} : vector<8x32xf32>, vector<32x32xf32>, vector<8x32xf32> -> vector<8x32xf32>
    %149 = arith.addf %147, %148 : vector<8x32xf32>
    %cst_64 = arith.constant 5.000000e-01 : f32
    %150 = vector.broadcast %cst_64 : f32 to vector<8x32xf32>
    %151 = arith.mulf %150, %149 : vector<8x32xf32>
    %152 = math.tanh %151 : vector<8x32xf32>
    %cst_65 = arith.constant 5.000000e-01 : f32
    %153 = vector.broadcast %cst_65 : f32 to vector<8x32xf32>
    %154 = arith.mulf %153, %152 : vector<8x32xf32>
    %cst_66 = arith.constant 5.000000e-01 : f32
    %155 = vector.broadcast %cst_66 : f32 to vector<8x32xf32>
    %156 = arith.addf %154, %155 : vector<8x32xf32>
    %157 = vector.extract_strided_slice %12 {offsets = [24, 0], sizes = [8, 32], strides = [1, 1]} : vector<64x32xf32> to vector<8x32xf32>
    %cst_67 = arith.constant dense<0.000000e+00> : vector<8x32xf32>
    %158 = tpu.matmul %136, %16, %cst_67 {dimension_numbers = #tpu.dot_dimension_numbers<[1], [0], [0], [1], [0, 0, 1, 1], [], []>} : vector<8x32xf32>, vector<32x32xf32>, vector<8x32xf32> -> vector<8x32xf32>
    %159 = arith.addf %157, %158 : vector<8x32xf32>
    %160 = math.tanh %159 : vector<8x32xf32>
    %161 = vector.extract_strided_slice %13 {offsets = [24, 0], sizes = [8, 32], strides = [1, 1]} : vector<64x32xf32> to vector<8x32xf32>
    %cst_68 = arith.constant dense<0.000000e+00> : vector<8x32xf32>
    %162 = tpu.matmul %136, %17, %cst_68 {dimension_numbers = #tpu.dot_dimension_numbers<[1], [0], [0], [1], [0, 0, 1, 1], [], []>} : vector<8x32xf32>, vector<32x32xf32>, vector<8x32xf32> -> vector<8x32xf32>
    %163 = arith.addf %161, %162 : vector<8x32xf32>
    %cst_69 = arith.constant 5.000000e-01 : f32
    %164 = vector.broadcast %cst_69 : f32 to vector<8x32xf32>
    %165 = arith.mulf %164, %163 : vector<8x32xf32>
    %166 = math.tanh %165 : vector<8x32xf32>
    %cst_70 = arith.constant 5.000000e-01 : f32
    %167 = vector.broadcast %cst_70 : f32 to vector<8x32xf32>
    %168 = arith.mulf %167, %166 : vector<8x32xf32>
    %cst_71 = arith.constant 5.000000e-01 : f32
    %169 = vector.broadcast %cst_71 : f32 to vector<8x32xf32>
    %170 = arith.addf %168, %169 : vector<8x32xf32>
    %171 = arith.mulf %156, %134 : vector<8x32xf32>
    %172 = arith.mulf %146, %160 : vector<8x32xf32>
    %173 = arith.addf %171, %172 : vector<8x32xf32>
    %174 = math.tanh %173 : vector<8x32xf32>
    %175 = arith.mulf %170, %174 : vector<8x32xf32>
    %176 = vector.extract_strided_slice %10 {offsets = [32, 0], sizes = [8, 32], strides = [1, 1]} : vector<64x32xf32> to vector<8x32xf32>
    %cst_72 = arith.constant dense<0.000000e+00> : vector<8x32xf32>
    %177 = tpu.matmul %175, %14, %cst_72 {dimension_numbers = #tpu.dot_dimension_numbers<[1], [0], [0], [1], [0, 0, 1, 1], [], []>} : vector<8x32xf32>, vector<32x32xf32>, vector<8x32xf32> -> vector<8x32xf32>
    %178 = arith.addf %176, %177 : vector<8x32xf32>
    %cst_73 = arith.constant 5.000000e-01 : f32
    %179 = vector.broadcast %cst_73 : f32 to vector<8x32xf32>
    %180 = arith.mulf %179, %178 : vector<8x32xf32>
    %181 = math.tanh %180 : vector<8x32xf32>
    %cst_74 = arith.constant 5.000000e-01 : f32
    %182 = vector.broadcast %cst_74 : f32 to vector<8x32xf32>
    %183 = arith.mulf %182, %181 : vector<8x32xf32>
    %cst_75 = arith.constant 5.000000e-01 : f32
    %184 = vector.broadcast %cst_75 : f32 to vector<8x32xf32>
    %185 = arith.addf %183, %184 : vector<8x32xf32>
    %186 = vector.extract_strided_slice %11 {offsets = [32, 0], sizes = [8, 32], strides = [1, 1]} : vector<64x32xf32> to vector<8x32xf32>
    %cst_76 = arith.constant dense<0.000000e+00> : vector<8x32xf32>
    %187 = tpu.matmul %175, %15, %cst_76 {dimension_numbers = #tpu.dot_dimension_numbers<[1], [0], [0], [1], [0, 0, 1, 1], [], []>} : vector<8x32xf32>, vector<32x32xf32>, vector<8x32xf32> -> vector<8x32xf32>
    %188 = arith.addf %186, %187 : vector<8x32xf32>
    %cst_77 = arith.constant 5.000000e-01 : f32
    %189 = vector.broadcast %cst_77 : f32 to vector<8x32xf32>
    %190 = arith.mulf %189, %188 : vector<8x32xf32>
    %191 = math.tanh %190 : vector<8x32xf32>
    %cst_78 = arith.constant 5.000000e-01 : f32
    %192 = vector.broadcast %cst_78 : f32 to vector<8x32xf32>
    %193 = arith.mulf %192, %191 : vector<8x32xf32>
    %cst_79 = arith.constant 5.000000e-01 : f32
    %194 = vector.broadcast %cst_79 : f32 to vector<8x32xf32>
    %195 = arith.addf %193, %194 : vector<8x32xf32>
    %196 = vector.extract_strided_slice %12 {offsets = [32, 0], sizes = [8, 32], strides = [1, 1]} : vector<64x32xf32> to vector<8x32xf32>
    %cst_80 = arith.constant dense<0.000000e+00> : vector<8x32xf32>
    %197 = tpu.matmul %175, %16, %cst_80 {dimension_numbers = #tpu.dot_dimension_numbers<[1], [0], [0], [1], [0, 0, 1, 1], [], []>} : vector<8x32xf32>, vector<32x32xf32>, vector<8x32xf32> -> vector<8x32xf32>
    %198 = arith.addf %196, %197 : vector<8x32xf32>
    %199 = math.tanh %198 : vector<8x32xf32>
    %200 = vector.extract_strided_slice %13 {offsets = [32, 0], sizes = [8, 32], strides = [1, 1]} : vector<64x32xf32> to vector<8x32xf32>
    %cst_81 = arith.constant dense<0.000000e+00> : vector<8x32xf32>
    %201 = tpu.matmul %175, %17, %cst_81 {dimension_numbers = #tpu.dot_dimension_numbers<[1], [0], [0], [1], [0, 0, 1, 1], [], []>} : vector<8x32xf32>, vector<32x32xf32>, vector<8x32xf32> -> vector<8x32xf32>
    %202 = arith.addf %200, %201 : vector<8x32xf32>
    %cst_82 = arith.constant 5.000000e-01 : f32
    %203 = vector.broadcast %cst_82 : f32 to vector<8x32xf32>
    %204 = arith.mulf %203, %202 : vector<8x32xf32>
    %205 = math.tanh %204 : vector<8x32xf32>
    %cst_83 = arith.constant 5.000000e-01 : f32
    %206 = vector.broadcast %cst_83 : f32 to vector<8x32xf32>
    %207 = arith.mulf %206, %205 : vector<8x32xf32>
    %cst_84 = arith.constant 5.000000e-01 : f32
    %208 = vector.broadcast %cst_84 : f32 to vector<8x32xf32>
    %209 = arith.addf %207, %208 : vector<8x32xf32>
    %210 = arith.mulf %195, %173 : vector<8x32xf32>
    %211 = arith.mulf %185, %199 : vector<8x32xf32>
    %212 = arith.addf %210, %211 : vector<8x32xf32>
    %213 = math.tanh %212 : vector<8x32xf32>
    %214 = arith.mulf %209, %213 : vector<8x32xf32>
    %215 = vector.extract_strided_slice %10 {offsets = [40, 0], sizes = [8, 32], strides = [1, 1]} : vector<64x32xf32> to vector<8x32xf32>
    %cst_85 = arith.constant dense<0.000000e+00> : vector<8x32xf32>
    %216 = tpu.matmul %214, %14, %cst_85 {dimension_numbers = #tpu.dot_dimension_numbers<[1], [0], [0], [1], [0, 0, 1, 1], [], []>} : vector<8x32xf32>, vector<32x32xf32>, vector<8x32xf32> -> vector<8x32xf32>
    %217 = arith.addf %215, %216 : vector<8x32xf32>
    %cst_86 = arith.constant 5.000000e-01 : f32
    %218 = vector.broadcast %cst_86 : f32 to vector<8x32xf32>
    %219 = arith.mulf %218, %217 : vector<8x32xf32>
    %220 = math.tanh %219 : vector<8x32xf32>
    %cst_87 = arith.constant 5.000000e-01 : f32
    %221 = vector.broadcast %cst_87 : f32 to vector<8x32xf32>
    %222 = arith.mulf %221, %220 : vector<8x32xf32>
    %cst_88 = arith.constant 5.000000e-01 : f32
    %223 = vector.broadcast %cst_88 : f32 to vector<8x32xf32>
    %224 = arith.addf %222, %223 : vector<8x32xf32>
    %225 = vector.extract_strided_slice %11 {offsets = [40, 0], sizes = [8, 32], strides = [1, 1]} : vector<64x32xf32> to vector<8x32xf32>
    %cst_89 = arith.constant dense<0.000000e+00> : vector<8x32xf32>
    %226 = tpu.matmul %214, %15, %cst_89 {dimension_numbers = #tpu.dot_dimension_numbers<[1], [0], [0], [1], [0, 0, 1, 1], [], []>} : vector<8x32xf32>, vector<32x32xf32>, vector<8x32xf32> -> vector<8x32xf32>
    %227 = arith.addf %225, %226 : vector<8x32xf32>
    %cst_90 = arith.constant 5.000000e-01 : f32
    %228 = vector.broadcast %cst_90 : f32 to vector<8x32xf32>
    %229 = arith.mulf %228, %227 : vector<8x32xf32>
    %230 = math.tanh %229 : vector<8x32xf32>
    %cst_91 = arith.constant 5.000000e-01 : f32
    %231 = vector.broadcast %cst_91 : f32 to vector<8x32xf32>
    %232 = arith.mulf %231, %230 : vector<8x32xf32>
    %cst_92 = arith.constant 5.000000e-01 : f32
    %233 = vector.broadcast %cst_92 : f32 to vector<8x32xf32>
    %234 = arith.addf %232, %233 : vector<8x32xf32>
    %235 = vector.extract_strided_slice %12 {offsets = [40, 0], sizes = [8, 32], strides = [1, 1]} : vector<64x32xf32> to vector<8x32xf32>
    %cst_93 = arith.constant dense<0.000000e+00> : vector<8x32xf32>
    %236 = tpu.matmul %214, %16, %cst_93 {dimension_numbers = #tpu.dot_dimension_numbers<[1], [0], [0], [1], [0, 0, 1, 1], [], []>} : vector<8x32xf32>, vector<32x32xf32>, vector<8x32xf32> -> vector<8x32xf32>
    %237 = arith.addf %235, %236 : vector<8x32xf32>
    %238 = math.tanh %237 : vector<8x32xf32>
    %239 = vector.extract_strided_slice %13 {offsets = [40, 0], sizes = [8, 32], strides = [1, 1]} : vector<64x32xf32> to vector<8x32xf32>
    %cst_94 = arith.constant dense<0.000000e+00> : vector<8x32xf32>
    %240 = tpu.matmul %214, %17, %cst_94 {dimension_numbers = #tpu.dot_dimension_numbers<[1], [0], [0], [1], [0, 0, 1, 1], [], []>} : vector<8x32xf32>, vector<32x32xf32>, vector<8x32xf32> -> vector<8x32xf32>
    %241 = arith.addf %239, %240 : vector<8x32xf32>
    %cst_95 = arith.constant 5.000000e-01 : f32
    %242 = vector.broadcast %cst_95 : f32 to vector<8x32xf32>
    %243 = arith.mulf %242, %241 : vector<8x32xf32>
    %244 = math.tanh %243 : vector<8x32xf32>
    %cst_96 = arith.constant 5.000000e-01 : f32
    %245 = vector.broadcast %cst_96 : f32 to vector<8x32xf32>
    %246 = arith.mulf %245, %244 : vector<8x32xf32>
    %cst_97 = arith.constant 5.000000e-01 : f32
    %247 = vector.broadcast %cst_97 : f32 to vector<8x32xf32>
    %248 = arith.addf %246, %247 : vector<8x32xf32>
    %249 = arith.mulf %234, %212 : vector<8x32xf32>
    %250 = arith.mulf %224, %238 : vector<8x32xf32>
    %251 = arith.addf %249, %250 : vector<8x32xf32>
    %252 = math.tanh %251 : vector<8x32xf32>
    %253 = arith.mulf %248, %252 : vector<8x32xf32>
    %254 = vector.extract_strided_slice %10 {offsets = [48, 0], sizes = [8, 32], strides = [1, 1]} : vector<64x32xf32> to vector<8x32xf32>
    %cst_98 = arith.constant dense<0.000000e+00> : vector<8x32xf32>
    %255 = tpu.matmul %253, %14, %cst_98 {dimension_numbers = #tpu.dot_dimension_numbers<[1], [0], [0], [1], [0, 0, 1, 1], [], []>} : vector<8x32xf32>, vector<32x32xf32>, vector<8x32xf32> -> vector<8x32xf32>
    %256 = arith.addf %254, %255 : vector<8x32xf32>
    %cst_99 = arith.constant 5.000000e-01 : f32
    %257 = vector.broadcast %cst_99 : f32 to vector<8x32xf32>
    %258 = arith.mulf %257, %256 : vector<8x32xf32>
    %259 = math.tanh %258 : vector<8x32xf32>
    %cst_100 = arith.constant 5.000000e-01 : f32
    %260 = vector.broadcast %cst_100 : f32 to vector<8x32xf32>
    %261 = arith.mulf %260, %259 : vector<8x32xf32>
    %cst_101 = arith.constant 5.000000e-01 : f32
    %262 = vector.broadcast %cst_101 : f32 to vector<8x32xf32>
    %263 = arith.addf %261, %262 : vector<8x32xf32>
    %264 = vector.extract_strided_slice %11 {offsets = [48, 0], sizes = [8, 32], strides = [1, 1]} : vector<64x32xf32> to vector<8x32xf32>
    %cst_102 = arith.constant dense<0.000000e+00> : vector<8x32xf32>
    %265 = tpu.matmul %253, %15, %cst_102 {dimension_numbers = #tpu.dot_dimension_numbers<[1], [0], [0], [1], [0, 0, 1, 1], [], []>} : vector<8x32xf32>, vector<32x32xf32>, vector<8x32xf32> -> vector<8x32xf32>
    %266 = arith.addf %264, %265 : vector<8x32xf32>
    %cst_103 = arith.constant 5.000000e-01 : f32
    %267 = vector.broadcast %cst_103 : f32 to vector<8x32xf32>
    %268 = arith.mulf %267, %266 : vector<8x32xf32>
    %269 = math.tanh %268 : vector<8x32xf32>
    %cst_104 = arith.constant 5.000000e-01 : f32
    %270 = vector.broadcast %cst_104 : f32 to vector<8x32xf32>
    %271 = arith.mulf %270, %269 : vector<8x32xf32>
    %cst_105 = arith.constant 5.000000e-01 : f32
    %272 = vector.broadcast %cst_105 : f32 to vector<8x32xf32>
    %273 = arith.addf %271, %272 : vector<8x32xf32>
    %274 = vector.extract_strided_slice %12 {offsets = [48, 0], sizes = [8, 32], strides = [1, 1]} : vector<64x32xf32> to vector<8x32xf32>
    %cst_106 = arith.constant dense<0.000000e+00> : vector<8x32xf32>
    %275 = tpu.matmul %253, %16, %cst_106 {dimension_numbers = #tpu.dot_dimension_numbers<[1], [0], [0], [1], [0, 0, 1, 1], [], []>} : vector<8x32xf32>, vector<32x32xf32>, vector<8x32xf32> -> vector<8x32xf32>
    %276 = arith.addf %274, %275 : vector<8x32xf32>
    %277 = math.tanh %276 : vector<8x32xf32>
    %278 = vector.extract_strided_slice %13 {offsets = [48, 0], sizes = [8, 32], strides = [1, 1]} : vector<64x32xf32> to vector<8x32xf32>
    %cst_107 = arith.constant dense<0.000000e+00> : vector<8x32xf32>
    %279 = tpu.matmul %253, %17, %cst_107 {dimension_numbers = #tpu.dot_dimension_numbers<[1], [0], [0], [1], [0, 0, 1, 1], [], []>} : vector<8x32xf32>, vector<32x32xf32>, vector<8x32xf32> -> vector<8x32xf32>
    %280 = arith.addf %278, %279 : vector<8x32xf32>
    %cst_108 = arith.constant 5.000000e-01 : f32
    %281 = vector.broadcast %cst_108 : f32 to vector<8x32xf32>
    %282 = arith.mulf %281, %280 : vector<8x32xf32>
    %283 = math.tanh %282 : vector<8x32xf32>
    %cst_109 = arith.constant 5.000000e-01 : f32
    %284 = vector.broadcast %cst_109 : f32 to vector<8x32xf32>
    %285 = arith.mulf %284, %283 : vector<8x32xf32>
    %cst_110 = arith.constant 5.000000e-01 : f32
    %286 = vector.broadcast %cst_110 : f32 to vector<8x32xf32>
    %287 = arith.addf %285, %286 : vector<8x32xf32>
    %288 = arith.mulf %273, %251 : vector<8x32xf32>
    %289 = arith.mulf %263, %277 : vector<8x32xf32>
    %290 = arith.addf %288, %289 : vector<8x32xf32>
    %291 = math.tanh %290 : vector<8x32xf32>
    %292 = arith.mulf %287, %291 : vector<8x32xf32>
    %293 = vector.extract_strided_slice %10 {offsets = [56, 0], sizes = [8, 32], strides = [1, 1]} : vector<64x32xf32> to vector<8x32xf32>
    %cst_111 = arith.constant dense<0.000000e+00> : vector<8x32xf32>
    %294 = tpu.matmul %292, %14, %cst_111 {dimension_numbers = #tpu.dot_dimension_numbers<[1], [0], [0], [1], [0, 0, 1, 1], [], []>} : vector<8x32xf32>, vector<32x32xf32>, vector<8x32xf32> -> vector<8x32xf32>
    %295 = arith.addf %293, %294 : vector<8x32xf32>
    %cst_112 = arith.constant 5.000000e-01 : f32
    %296 = vector.broadcast %cst_112 : f32 to vector<8x32xf32>
    %297 = arith.mulf %296, %295 : vector<8x32xf32>
    %298 = math.tanh %297 : vector<8x32xf32>
    %cst_113 = arith.constant 5.000000e-01 : f32
    %299 = vector.broadcast %cst_113 : f32 to vector<8x32xf32>
    %300 = arith.mulf %299, %298 : vector<8x32xf32>
    %cst_114 = arith.constant 5.000000e-01 : f32
    %301 = vector.broadcast %cst_114 : f32 to vector<8x32xf32>
    %302 = arith.addf %300, %301 : vector<8x32xf32>
    %303 = vector.extract_strided_slice %11 {offsets = [56, 0], sizes = [8, 32], strides = [1, 1]} : vector<64x32xf32> to vector<8x32xf32>
    %cst_115 = arith.constant dense<0.000000e+00> : vector<8x32xf32>
    %304 = tpu.matmul %292, %15, %cst_115 {dimension_numbers = #tpu.dot_dimension_numbers<[1], [0], [0], [1], [0, 0, 1, 1], [], []>} : vector<8x32xf32>, vector<32x32xf32>, vector<8x32xf32> -> vector<8x32xf32>
    %305 = arith.addf %303, %304 : vector<8x32xf32>
    %cst_116 = arith.constant 5.000000e-01 : f32
    %306 = vector.broadcast %cst_116 : f32 to vector<8x32xf32>
    %307 = arith.mulf %306, %305 : vector<8x32xf32>
    %308 = math.tanh %307 : vector<8x32xf32>
    %cst_117 = arith.constant 5.000000e-01 : f32
    %309 = vector.broadcast %cst_117 : f32 to vector<8x32xf32>
    %310 = arith.mulf %309, %308 : vector<8x32xf32>
    %cst_118 = arith.constant 5.000000e-01 : f32
    %311 = vector.broadcast %cst_118 : f32 to vector<8x32xf32>
    %312 = arith.addf %310, %311 : vector<8x32xf32>
    %313 = vector.extract_strided_slice %12 {offsets = [56, 0], sizes = [8, 32], strides = [1, 1]} : vector<64x32xf32> to vector<8x32xf32>
    %cst_119 = arith.constant dense<0.000000e+00> : vector<8x32xf32>
    %314 = tpu.matmul %292, %16, %cst_119 {dimension_numbers = #tpu.dot_dimension_numbers<[1], [0], [0], [1], [0, 0, 1, 1], [], []>} : vector<8x32xf32>, vector<32x32xf32>, vector<8x32xf32> -> vector<8x32xf32>
    %315 = arith.addf %313, %314 : vector<8x32xf32>
    %316 = math.tanh %315 : vector<8x32xf32>
    %317 = vector.extract_strided_slice %13 {offsets = [56, 0], sizes = [8, 32], strides = [1, 1]} : vector<64x32xf32> to vector<8x32xf32>
    %cst_120 = arith.constant dense<0.000000e+00> : vector<8x32xf32>
    %318 = tpu.matmul %292, %17, %cst_120 {dimension_numbers = #tpu.dot_dimension_numbers<[1], [0], [0], [1], [0, 0, 1, 1], [], []>} : vector<8x32xf32>, vector<32x32xf32>, vector<8x32xf32> -> vector<8x32xf32>
    %319 = arith.addf %317, %318 : vector<8x32xf32>
    %cst_121 = arith.constant 5.000000e-01 : f32
    %320 = vector.broadcast %cst_121 : f32 to vector<8x32xf32>
    %321 = arith.mulf %320, %319 : vector<8x32xf32>
    %322 = math.tanh %321 : vector<8x32xf32>
    %cst_122 = arith.constant 5.000000e-01 : f32
    %323 = vector.broadcast %cst_122 : f32 to vector<8x32xf32>
    %324 = arith.mulf %323, %322 : vector<8x32xf32>
    %cst_123 = arith.constant 5.000000e-01 : f32
    %325 = vector.broadcast %cst_123 : f32 to vector<8x32xf32>
    %326 = arith.addf %324, %325 : vector<8x32xf32>
    %327 = arith.mulf %312, %290 : vector<8x32xf32>
    %328 = arith.mulf %302, %316 : vector<8x32xf32>
    %329 = arith.addf %327, %328 : vector<8x32xf32>
    %330 = math.tanh %329 : vector<8x32xf32>
    %331 = arith.mulf %326, %330 : vector<8x32xf32>
    %c0_124 = arith.constant 0 : index
    %c0_125 = arith.constant 0 : index
    %332 = vector.load %arg14[%c0_124, %c0_125] : memref<1x128xf32, #tpu.memory_space<vmem>>, vector<1x128xf32>
    %c0_126 = arith.constant 0 : index
    %c0_127 = arith.constant 0 : index
    %333 = vector.load %arg2[%c0_126, %c0_127] : memref<1x32xf32, #tpu.memory_space<vmem>>, vector<1x32xf32>
    %c0_128 = arith.constant 0 : index
    %c0_129 = arith.constant 0 : index
    %334 = vector.load %arg12[%c0_128, %c0_129] : memref<32x128xf32, #tpu.memory_space<vmem>>, vector<32x128xf32>
    %cst_130 = arith.constant dense<0.000000e+00> : vector<1x128xf32>
    %335 = tpu.matmul %333, %334, %cst_130 {dimension_numbers = #tpu.dot_dimension_numbers<[1], [0], [0], [1], [0, 0, 1, 1], [], []>} : vector<1x32xf32>, vector<32x128xf32>, vector<1x128xf32> -> vector<1x128xf32>
    %336 = arith.addf %332, %335 : vector<1x128xf32>
    %c0_131 = arith.constant 0 : index
    %c0_132 = arith.constant 0 : index
    %337 = vector.load %arg3[%c0_131, %c0_132] : memref<1x8xf32, #tpu.memory_space<vmem>>, vector<1x8xf32>
    %c0_133 = arith.constant 0 : index
    %c0_134 = arith.constant 0 : index
    %338 = vector.load %arg13[%c0_133, %c0_134] : memref<8x128xf32, #tpu.memory_space<vmem>>, vector<8x128xf32>
    %cst_135 = arith.constant dense<0.000000e+00> : vector<1x128xf32>
    %339 = tpu.matmul %337, %338, %cst_135 {dimension_numbers = #tpu.dot_dimension_numbers<[1], [0], [0], [1], [0, 0, 1, 1], [], []>} : vector<1x8xf32>, vector<8x128xf32>, vector<1x128xf32> -> vector<1x128xf32>
    %340 = arith.addf %336, %339 : vector<1x128xf32>
    %341 = vector.extract_strided_slice %331 {offsets = [0, 0], sizes = [1, 32], strides = [1, 1]} : vector<8x32xf32> to vector<1x32xf32>
    %c0_136 = arith.constant 0 : index
    %c0_137 = arith.constant 0 : index
    %342 = vector.load %arg11[%c0_136, %c0_137] : memref<256x128xf32, #tpu.memory_space<vmem>>, vector<32x128xf32>
    %cst_138 = arith.constant dense<0.000000e+00> : vector<1x128xf32>
    %343 = tpu.matmul %341, %342, %cst_138 {dimension_numbers = #tpu.dot_dimension_numbers<[1], [0], [0], [1], [0, 0, 1, 1], [], []>} : vector<1x32xf32>, vector<32x128xf32>, vector<1x128xf32> -> vector<1x128xf32>
    %344 = arith.addf %340, %343 : vector<1x128xf32>
    %345 = vector.extract_strided_slice %331 {offsets = [1, 0], sizes = [1, 32], strides = [1, 1]} : vector<8x32xf32> to vector<1x32xf32>
    %c32 = arith.constant 32 : index
    %c0_139 = arith.constant 0 : index
    %346 = vector.load %arg11[%c32, %c0_139] : memref<256x128xf32, #tpu.memory_space<vmem>>, vector<32x128xf32>
    %cst_140 = arith.constant dense<0.000000e+00> : vector<1x128xf32>
    %347 = tpu.matmul %345, %346, %cst_140 {dimension_numbers = #tpu.dot_dimension_numbers<[1], [0], [0], [1], [0, 0, 1, 1], [], []>} : vector<1x32xf32>, vector<32x128xf32>, vector<1x128xf32> -> vector<1x128xf32>
    %348 = arith.addf %344, %347 : vector<1x128xf32>
    %349 = vector.extract_strided_slice %331 {offsets = [2, 0], sizes = [1, 32], strides = [1, 1]} : vector<8x32xf32> to vector<1x32xf32>
    %c64 = arith.constant 64 : index
    %c0_141 = arith.constant 0 : index
    %350 = vector.load %arg11[%c64, %c0_141] : memref<256x128xf32, #tpu.memory_space<vmem>>, vector<32x128xf32>
    %cst_142 = arith.constant dense<0.000000e+00> : vector<1x128xf32>
    %351 = tpu.matmul %349, %350, %cst_142 {dimension_numbers = #tpu.dot_dimension_numbers<[1], [0], [0], [1], [0, 0, 1, 1], [], []>} : vector<1x32xf32>, vector<32x128xf32>, vector<1x128xf32> -> vector<1x128xf32>
    %352 = arith.addf %348, %351 : vector<1x128xf32>
    %353 = vector.extract_strided_slice %331 {offsets = [3, 0], sizes = [1, 32], strides = [1, 1]} : vector<8x32xf32> to vector<1x32xf32>
    %c96 = arith.constant 96 : index
    %c0_143 = arith.constant 0 : index
    %354 = vector.load %arg11[%c96, %c0_143] : memref<256x128xf32, #tpu.memory_space<vmem>>, vector<32x128xf32>
    %cst_144 = arith.constant dense<0.000000e+00> : vector<1x128xf32>
    %355 = tpu.matmul %353, %354, %cst_144 {dimension_numbers = #tpu.dot_dimension_numbers<[1], [0], [0], [1], [0, 0, 1, 1], [], []>} : vector<1x32xf32>, vector<32x128xf32>, vector<1x128xf32> -> vector<1x128xf32>
    %356 = arith.addf %352, %355 : vector<1x128xf32>
    %357 = vector.extract_strided_slice %331 {offsets = [4, 0], sizes = [1, 32], strides = [1, 1]} : vector<8x32xf32> to vector<1x32xf32>
    %c128 = arith.constant 128 : index
    %c0_145 = arith.constant 0 : index
    %358 = vector.load %arg11[%c128, %c0_145] : memref<256x128xf32, #tpu.memory_space<vmem>>, vector<32x128xf32>
    %cst_146 = arith.constant dense<0.000000e+00> : vector<1x128xf32>
    %359 = tpu.matmul %357, %358, %cst_146 {dimension_numbers = #tpu.dot_dimension_numbers<[1], [0], [0], [1], [0, 0, 1, 1], [], []>} : vector<1x32xf32>, vector<32x128xf32>, vector<1x128xf32> -> vector<1x128xf32>
    %360 = arith.addf %356, %359 : vector<1x128xf32>
    %361 = vector.extract_strided_slice %331 {offsets = [5, 0], sizes = [1, 32], strides = [1, 1]} : vector<8x32xf32> to vector<1x32xf32>
    %c160 = arith.constant 160 : index
    %c0_147 = arith.constant 0 : index
    %362 = vector.load %arg11[%c160, %c0_147] : memref<256x128xf32, #tpu.memory_space<vmem>>, vector<32x128xf32>
    %cst_148 = arith.constant dense<0.000000e+00> : vector<1x128xf32>
    %363 = tpu.matmul %361, %362, %cst_148 {dimension_numbers = #tpu.dot_dimension_numbers<[1], [0], [0], [1], [0, 0, 1, 1], [], []>} : vector<1x32xf32>, vector<32x128xf32>, vector<1x128xf32> -> vector<1x128xf32>
    %364 = arith.addf %360, %363 : vector<1x128xf32>
    %365 = vector.extract_strided_slice %331 {offsets = [6, 0], sizes = [1, 32], strides = [1, 1]} : vector<8x32xf32> to vector<1x32xf32>
    %c192 = arith.constant 192 : index
    %c0_149 = arith.constant 0 : index
    %366 = vector.load %arg11[%c192, %c0_149] : memref<256x128xf32, #tpu.memory_space<vmem>>, vector<32x128xf32>
    %cst_150 = arith.constant dense<0.000000e+00> : vector<1x128xf32>
    %367 = tpu.matmul %365, %366, %cst_150 {dimension_numbers = #tpu.dot_dimension_numbers<[1], [0], [0], [1], [0, 0, 1, 1], [], []>} : vector<1x32xf32>, vector<32x128xf32>, vector<1x128xf32> -> vector<1x128xf32>
    %368 = arith.addf %364, %367 : vector<1x128xf32>
    %369 = vector.extract_strided_slice %331 {offsets = [7, 0], sizes = [1, 32], strides = [1, 1]} : vector<8x32xf32> to vector<1x32xf32>
    %c224 = arith.constant 224 : index
    %c0_151 = arith.constant 0 : index
    %370 = vector.load %arg11[%c224, %c0_151] : memref<256x128xf32, #tpu.memory_space<vmem>>, vector<32x128xf32>
    %cst_152 = arith.constant dense<0.000000e+00> : vector<1x128xf32>
    %371 = tpu.matmul %369, %370, %cst_152 {dimension_numbers = #tpu.dot_dimension_numbers<[1], [0], [0], [1], [0, 0, 1, 1], [], []>} : vector<1x32xf32>, vector<32x128xf32>, vector<1x128xf32> -> vector<1x128xf32>
    %372 = arith.addf %368, %371 : vector<1x128xf32>
    %cst_153 = arith.constant 0.000000e+00 : f32
    %373 = vector.broadcast %cst_153 : f32 to vector<1x128xf32>
    %374 = arith.maximumf %372, %373 : vector<1x128xf32>
    %c0_154 = arith.constant 0 : index
    %c0_155 = arith.constant 0 : index
    %375 = vector.load %arg15[%c0_154, %c0_155] : memref<1x128xf32, #tpu.memory_space<vmem>>, vector<1x128xf32>
    tpu.vector_store %arg15[%c0_154, %c0_155], %374 {strides = array<i32>} : memref<1x128xf32, #tpu.memory_space<vmem>>, vector<1x128xf32>,
    return
  }
}

</mosaic_0001>

<bundles_post_ra>
// kernel: tpu_custom_call.1
= control target key start
LH: loop header
LB: loop body
LE: loop exit
PB: predicated region body
PF: predicated region fallthrough
CT: control target
= control target key end

     0   :  { %s5847_s0 = inlined_call_operand.vmem [shape: f32[64,4], index: 0, kind: input, shape index: {}]   ;;  %s5848_s1 = inlined_call_operand.vmem [shape: f32[64,16], index: 1, kind: input, shape index: {}]   ;;  %s5849_s2 = inlined_call_operand.vmem [shape: f32[1,32], index: 2, kind: input, shape index: {}]   ;;  %s5850_s3 = inlined_call_operand.vmem [shape: f32[1,8], index: 3, kind: input, shape index: {}]   ;;  %s5851_s4 = inlined_call_operand.hbm [shape: f32[4,128], index: 4, kind: input, shape index: {}]   ;;  %s5852_s5 = inlined_call_operand.hbm [shape: f32[16,128], index: 5, kind: input, shape index: {}]   ;;  %s5853_s6 = inlined_call_operand.hbm [shape: f32[1,128], index: 6, kind: input, shape index: {}]   ;;  %s5854_s7 = inlined_call_operand.vmem [shape: f32[32,32], index: 7, kind: input, shape index: {}]   ;;  %s5855_s8 = inlined_call_operand.vmem [shape: f32[32,32], index: 8, kind: input, shape index: {}]   ;;  %s5856_s9 = inlined_call_operand.vmem [shape: f32[32,32], index: 9, kind: input, shape index: {}]   ;;  %s5857_s10 = inlined_call_operand.vmem [shape: f32[32,32], index: 10, kind: input, shape index: {}]   ;;  %s5858_s11 = inlined_call_operand.hbm [shape: f32[256,128], index: 11, kind: input, shape index: {}]   ;;  %s5859_s12 = inlined_call_operand.vmem [shape: f32[32,128], index: 12, kind: input, shape index: {}]   ;;  %s5860_s13 = inlined_call_operand.vmem [shape: f32[8,128], index: 13, kind: input, shape index: {}]   ;;  %s5861_s14 = inlined_call_operand.vmem [shape: f32[1,128], index: 14, kind: input, shape index: {}]   ;;  %s5862_s15 = inlined_call_operand.hbm [shape: f32[1,128], index: 15, kind: output, shape index: {}]  }
   0x1   :  { %5864 = sst [smem:[#allocation15_spill]] %s5862_s15 }
   0x2   :  { %20 = vsyncpa [#allocation3], 0 }
   0x3   :  { %21 = vsyncpa [#allocation6], 0 }
   0x4   :  { %22 = vsyncpa [#allocation9], 0 }
   0x5   :  { %23 = vsyncpa [#allocation4], 0  ;;  %s5135_s18 = smov [#allocation5]   ;;  %s5017_s22 = scalar_lea.hbm %s5852_s5, 256 }
   0x6   :  { %s47_s19 = sshll.u32 %s5135_s18, 4  ;;  %p5018_p0 = scmp.ne.s32.totalorder %s5852_s5, %s5017_s22  ;;  %s48_s19 = int_to_ptr.vmem [resolvable:$true] %s47_s19 }
   0x7   :  { %p5021_p1 = scmp.lt.u32.totalorder %s5017_s22, %s5852_s5 }
   0x9   :  { %p5023_p2 = pnand %p5021_p1, %p5018_p0 }
   0xb   :  { %5026 = shalt.err (!%p5023_p2)
}
   0xc   :  { %s5027_s27 = scalar_lea.vmem %s48_s19, 256  ;;  %p5032_p4 = scmp.lt.s32.totalorder %s48_s19, %s48_s19 }
   0xd   :  { %p5028_p3 = scmp.ne.s32.totalorder %s48_s19, %s5027_s27  ;;  %p5033_p5 = scmp.lt.s32.totalorder %s5027_s27, %s5027_s27 }
   0xf   :  { %p5034_p6 = por %p5033_p5, %p5032_p4 }
  0x11   :  { %p5035_p7 = pnand %p5034_p6, %p5028_p3 }
  0x13   :  { %5038 = shalt.err (!%p5035_p7)
}
  0x14   :  { %s5136_s28 = smov 128   ;;  %s5137_s29 = smov 8  }
  0x15   :  { %53 = dma.hbm_to_vmem [thread:$0]  %s5852_s5, 256, %s48_s19, [#allocation6], %s5136_s28, %s5136_s28, %s5137_s29  }
  0x16   :  { %s5138_s17 = smov [#allocation2]   ;;  %s5139_s20 = smov [#allocation7]  }
  0x17   :  { %s38_s18 = sshll.u32 %s5138_s17, 4  ;;  %s60_s21 = sshll.u32 %s5139_s20, 4  ;;  %s39_s18 = int_to_ptr.vmem [resolvable:$true] %s38_s18  ;;  %s61_s21 = int_to_ptr.vmem [resolvable:$true] %s60_s21 }
  0x18   :  { %s5039_s24 = scalar_lea.hbm %s5851_s4, 64 }
  0x19   :  { %p5040_p8 = scmp.ne.s32.totalorder %s5851_s4, %s5039_s24  ;;  %p5043_p9 = scmp.lt.u32.totalorder %s5039_s24, %s5851_s4 }
  0x1b   :  { %p5045_p10 = pnand %p5043_p9, %p5040_p8 }
  0x1d   :  { %5048 = shalt.err (!%p5045_p10)
}
  0x1e   :  { %s5049_s5 = scalar_lea.vmem %s39_s18, 64  ;;  %p5054_p12 = scmp.lt.s32.totalorder %s39_s18, %s39_s18 }
  0x1f   :  { %p5050_p11 = scmp.ne.s32.totalorder %s39_s18, %s5049_s5  ;;  %p5055_p13 = scmp.lt.s32.totalorder %s5049_s5, %s5049_s5 }
  0x21   :  { %p5056_p0 = por %p5055_p13, %p5054_p12 }
  0x23   :  { %p5057_p1 = pnand %p5056_p0, %p5050_p11 }
  0x25   :  { %5060 = shalt.err (!%p5057_p1)
}
  0x26   :  { %41 = dma.hbm_to_vmem [thread:$0]  %s5851_s4, 64, %s39_s18, [#allocation3]  }
  0x27   :  { %s5061_s20 = scalar_lea.hbm %s5853_s6, 16 }
  0x28   :  { %p5062_p2 = scmp.ne.s32.totalorder %s5853_s6, %s5061_s20  ;;  %p5065_p3 = scmp.lt.u32.totalorder %s5061_s20, %s5853_s6 }
  0x2a   :  { %p5067_p4 = pnand %p5065_p3, %p5062_p2 }
  0x2c   :  { %5070 = shalt.err (!%p5067_p4)
}
  0x2d   :  { %s5071_s25 = scalar_lea.vmem %s61_s21, 16  ;;  %s5075_s26 = scalar_lea.vmem %s61_s21, 32 }
  0x2e   :  { %p5072_p5 = scmp.ne.s32.totalorder %s61_s21, %s5071_s25  ;;  %p5076_p6 = scmp.lt.s32.totalorder %s61_s21, %s61_s21 }
  0x2f   :  { %p5077_p7 = scmp.lt.s32.totalorder %s5075_s26, %s5071_s25 }
  0x31   :  { %p5078_p8 = por %p5077_p7, %p5076_p6 }
  0x33   :  { %p5079_p9 = pnand %p5078_p8, %p5072_p5 }
  0x35   :  { %5082 = shalt.err (!%p5079_p9)
}
  0x36   :  { %63 = dma.hbm_to_vmem [thread:$0]  %s5853_s6, 16, %s61_s21, [#allocation6]  }
  0x37   :  { %s5140_s27 = smov [#allocation8]   ;;  %s5083_s16 = scalar_lea.hbm %s5858_s11, 4096 }
  0x38   :  { %s77_s5 = sshll.u32 %s5140_s27, 4  ;;  %p5084_p10 = scmp.ne.s32.totalorder %s5858_s11, %s5083_s16  ;;  %s78_s5 = int_to_ptr.vmem [resolvable:$true] %s77_s5 }
  0x39   :  { %p5087_p11 = scmp.lt.u32.totalorder %s5083_s16, %s5858_s11 }
  0x3b   :  { %p5089_p12 = pnand %p5087_p11, %p5084_p10 }
  0x3d   :  { %5092 = shalt.err (!%p5089_p12)
}
  0x3e   :  { %s5093_s23 = scalar_lea.vmem %s78_s5, 4096  ;;  %p5098_p0 = scmp.lt.s32.totalorder %s78_s5, %s78_s5 }
  0x3f   :  { %p5094_p13 = scmp.ne.s32.totalorder %s78_s5, %s5093_s23  ;;  %p5099_p1 = scmp.lt.s32.totalorder %s5093_s23, %s5093_s23 }
  0x41   :  { %p5100_p2 = por %p5099_p1, %p5098_p0 }
  0x43   :  { %p5101_p3 = pnand %p5100_p2, %p5094_p13 }
  0x45   :  { %5104 = shalt.err (!%p5101_p3)
}
  0x46   :  { %83 = dma.hbm_to_vmem [thread:$0]  %s5858_s11, 4096, %s78_s5, [#allocation9], %s5136_s28, %s5136_s28, %s5137_s29  }
  0x47   :  { %5127 = dma.done.wait [#allocation3], 64  }
  0x48   :  { %5128 = vsyncadd [#allocation3], 4294967232 }
  0x49   :  { %5129 = dma.done.wait [#allocation6], 272  }
  0x4a   :  { %5130 = vsyncadd [#allocation6], 4294967024 }
  0x4b   :  { %5131 = dma.done.wait [#allocation9], 4096  }
  0x4c   :  { %5132 = vsyncadd [#allocation9], 4294963200  ;;  %v5141_v0 = vmov 0.0|0.0   ;;  %vm5142_vm0 = vmmov 0   ;;  %v5143_v1 = vmov 0.0   ;;  %vm121_vm1 = vcmask 130048  }
  0x4d   :  { %4687 = vmatprep.subr.bf16.mxu0 %v5141_v0  ;;  %4265 = vmatprep.mubr.msk.f32.mxu0 %vm5142_vm0, %v5143_v1  ;;  %v119_v2 = vld [vmem:[#allocation5] sm:$0xff]  ;;  %v120_v3 = vld [vmem:[#allocation5 + $0x8] sm:$0xff]  ;;  %v111_v4 = vld [vmem:[%s5848_s1] sm:$0xff]  ;;  %vm276_vm2 = vcmask 1043456   ;;  %vm251_vm3 = vcmask 31744   ;;  %s5145_s23 = smov 64  }
  0x4e   :  { %v4647_v5 = vpack.c.bf16 %v120_v3, %v119_v2  ;;  %4165 = vmatprep.mubr.msk.f32.mxu1 %vm121_vm1, %v111_v4  ;;  %v110_v6 = vld [vmem:[#allocation2] sm:$0xf]  ;;  %v113_v8 = vld [vmem:[%s5848_s1 + $0x10] sm:$0xff]  ;;  %v114_v9 = vld [vmem:[%s5848_s1 + $0x18] sm:$0xff]  ;;  %s5146_s6 = smov 96   ;;  %vm416_vm4 = vcmask 261120  }
  0x4f   :  { %v112_v7 = vld [vmem:[%s5848_s1 + $0x8] sm:$0xff]  ;;  %v115_v10 = vld [vmem:[%s5848_s1 + $0x20] sm:$0xff]  ;;  %v410_v14 = vld [vmem:[%s5856_s9 + $0x10] sm:$0xff]  ;;  %vm3145_vm5 = vcmask 64512  }
  0x50   :  { %4648 = vmatprep.subr.bf16.mxu1 %v4647_v5  ;;  %v408_v11 = vld [vmem:[%s5856_s9] sm:$0xff]  ;;  %v409_v12 = vld [vmem:[%s5856_s9 + $0x8] sm:$0xff]  ;;  %v411_v15 = vld [vmem:[%s5856_s9 + $0x18] sm:$0xff] }
  0x51   :  { %4650 = vmatpush3.bf16.msra.mxu1 %v4647_v5  ;;  %v5310_v13 = vpack.c.bf16 %v409_v12, %v408_v11  ;;  %v116_v16 = vld [vmem:[%s5848_s1 + $0x28] sm:$0xff]  ;;  %v117_v17 = vld [vmem:[%s5848_s1 + $0x30] sm:$0xff]  ;;  %v5328_v18 = vpack.c.bf16 %v411_v15, %v410_v14  ;;  %v118_v19 = vld [vmem:[%s5848_s1 + $0x38] sm:$0xff] }
  0x52   :  { %4177 = vmatprep.subr.msk.mxu1 %vm276_vm2, %v110_v6  ;;  %v102_v20 = vld [vmem:[%s5847_s0] sm:$0xff]  ;;  %v401_v22 = vld [vmem:[%s5854_s7 + $0x8] sm:$0xff]  ;;  %v104_v25 = vld [vmem:[%s5847_s0 + $0x10] sm:$0xff] }
  0x53   :  { %4689 = vmatpush3.bf16.msra.mxu0 %v5310_v13  ;;  %v400_v21 = vld [vmem:[%s5854_s7] sm:$0xff]  ;;  %v103_v23 = vld [vmem:[%s5847_s0 + $0x8] sm:$0xff]  ;;  %v402_v26 = vld [vmem:[%s5854_s7 + $0x10] sm:$0xff] }
  0x54   :  { %4166 = vmatmul.mubr.msk.f32.vlgmr.msra.gmra.mrb[0].mxu1 %vm121_vm1, %v112_v7  ;;  %4690 = vmatprep.subr.bf16.mxu0 %v5141_v0  ;;  %v5351_v24 = vpack.c.bf16 %v401_v22, %v400_v21  ;;  %v403_v27 = vld [vmem:[%s5854_s7 + $0x18] sm:$0xff]  ;;  %v106_v30 = vld [vmem:[%s5847_s0 + $0x20] sm:$0xff]  ;;  %v107_v31 = vld [vmem:[%s5847_s0 + $0x28] sm:$0xff] }
  0x55   :  { %4178 = vmatpush3.msk.msra.mxu1 %vm276_vm2, %v110_v6  ;;  %4168 = vmatprep.mubr.msk.f32.mxu1 %vm121_vm1, %v113_v8  ;;  %v105_v28 = vld [vmem:[%s5847_s0 + $0x18] sm:$0xff]  ;;  %v5368_v29 = vpack.c.bf16 %v403_v27, %v402_v26  ;;  %v108_v32 = vld [vmem:[%s5847_s0 + $0x30] sm:$0xff]  ;;  %v404_v34 = vld [vmem:[%s5855_s8] sm:$0xff] }
  0x56   :  { %4651 = vmatprep.subr.bf16.mxu1 %v5141_v0  ;;  %v109_v33 = vld [vmem:[%s5847_s0 + $0x38] sm:$0xff]  ;;  %v405_v35 = vld [vmem:[%s5855_s8 + $0x8] sm:$0xff]  ;;  %v406_v37 = vld [vmem:[%s5855_s8 + $0x10] sm:$0xff] }
  0x57   :  { %4692 = vmatpush3.bf16.msra.mxu0 %v5328_v18  ;;  %v5398_v36 = vpack.c.bf16 %v405_v35, %v404_v34  ;;  %v407_v38 = vld [vmem:[%s5855_s8 + $0x18] sm:$0xff]  ;;  %v412_v40 = vld [vmem:[%s5857_s10] sm:$0xff]  ;;  %v413_v41 = vld [vmem:[%s5857_s10 + $0x8] sm:$0xff] }
  0x58   :  { %4169 = vmatmul.mubr.msk.f32.gmra.mrb[2].mxu1 %vm121_vm1, %v114_v9  ;;  %4699 = vmatprep.subr.bf16.mxu0 %v5141_v0  ;;  %v5408_v39 = vpack.c.bf16 %v407_v38, %v406_v37  ;;  %v5427_v42 = vpack.c.bf16 %v413_v41, %v412_v40  ;;  %v414_v43 = vld [vmem:[%s5857_s10 + $0x10] sm:$0xff]  ;;  %v415_v44 = vld [vmem:[%s5857_s10 + $0x18] sm:$0xff]  ;;  %s5144_s10 = smov 32  }
  0x59   :  { %4171 = vmatprep.mubr.msk.f32.mxu1 %vm121_vm1, %v115_v10  ;;  %v5438_v45 = vpack.c.bf16 %v415_v44, %v414_v43  ;;  %v3896_v46 = vld [vmem:[#allocation7] ss:$0 sm:$0xff] }
  0x5c   :  { %4172 = vmatmul.mubr.msk.f32.gmra.mrb[4].mxu1 %vm121_vm1, %v116_v16 }
  0x5d   :  { %4174 = vmatprep.mubr.msk.f32.mxu1 %vm121_vm1, %v117_v17 }
  0x60   :  { %4175 = vmatmul.mubr.msk.f32.gmra.mrb[6].mxu1 %vm121_vm1, %v118_v19 }
  0x61   :  { %4179 = vmatprep.mubr.msk.f32.mxu1 %vm251_vm3, %v102_v20 }
  0x64   :  { %4180 = vmatmul.mubr.msk.f32.vlgmr.msra.gmra.mrb[0].mxu1 %vm251_vm3, %v103_v23 }
  0x65   :  { %4653 = vmatpush3.bf16.msra.mxu1 %v5351_v24  ;;  %4182 = vmatprep.mubr.msk.f32.mxu1 %vm251_vm3, %v104_v25 }
  0x66   :  { %4654 = vmatprep.subr.bf16.mxu1 %v5141_v0 }
  0x68   :  { %4183 = vmatmul.mubr.msk.f32.gmra.mrb[2].mxu1 %vm251_vm3, %v105_v28 }
  0x69   :  { %4185 = vmatprep.mubr.msk.f32.mxu1 %vm251_vm3, %v106_v30  ;;  %4656 = vmatpush3.bf16.msra.mxu1 %v5368_v29 }
  0x6a   :  { %4657 = vmatprep.subr.bf16.mxu1 %v5141_v0 }
  0x6c   :  { %4186 = vmatmul.mubr.msk.f32.gmra.mrb[4].mxu1 %vm251_vm3, %v107_v31 }
  0x6d   :  { %4188 = vmatprep.mubr.msk.f32.mxu1 %vm251_vm3, %v108_v32 }
  0x70   :  { %4189 = vmatmul.mubr.msk.f32.gmra.mrb[6].mxu1 %vm251_vm3, %v109_v33 }
  0x71   :  { %4199 = vmatprep.mubr.msk.f32.mxu1 %vm5142_vm0, %v5143_v1 }
  0x74   :  { %4200 = vmatmul.mubr.f32.vlgmr.msra.gmra.mrb[8].mxu1 %v5143_v1 }
  0x75   :  { %4659 = vmatpush3.bf16.msra.mxu1 %v5398_v36  ;;  %4210 = vmatprep.mubr.msk.f32.mxu1 %vm5142_vm0, %v5143_v1 }
  0x76   :  { %4660 = vmatprep.subr.bf16.mxu1 %v5141_v0 }
  0x79   :  { %4662 = vmatpush3.bf16.msra.mxu1 %v5408_v39 }
  0x7a   :  { %4663 = vmatprep.subr.bf16.mxu1 %v5141_v0 }
  0x7c   :  { %4211 = vmatmul.mubr.f32.vlgmr.msra.gmra.mrb[10].mxu1 %v5143_v1 }
  0x7d   :  { %4665 = vmatpush3.bf16.msra.mxu1 %v5310_v13  ;;  %4221 = vmatprep.mubr.msk.f32.mxu1 %vm5142_vm0, %v5143_v1 }
  0x7e   :  { %4666 = vmatprep.subr.bf16.mxu1 %v5141_v0 }
  0x81   :  { %4668 = vmatpush3.bf16.msra.mxu1 %v5328_v18 }
  0x82   :  { %4669 = vmatprep.subr.bf16.mxu1 %v5141_v0 }
  0x84   :  { %4222 = vmatmul.mubr.f32.vlgmr.msra.gmra.mrb[12].mxu1 %v5143_v1 }
  0x85   :  { %4671 = vmatpush3.bf16.msra.mxu1 %v5427_v42  ;;  %4232 = vmatprep.mubr.msk.f32.mxu1 %vm5142_vm0, %v5143_v1 }
  0x86   :  { %4672 = vmatprep.subr.bf16.mxu1 %v5141_v0 }
  0x89   :  { %4674 = vmatpush3.bf16.msra.mxu1 %v5438_v45 }
  0x8a   :  { %4675 = vmatprep.subr.bf16.mxu1 %v5141_v0 }
  0x8c   :  { %4233 = vmatmul.mubr.f32.vlgmr.msra.gmra.mrb[14].mxu1 %v5143_v1 }
  0x8d   :  { %4677 = vmatpush3.bf16.msra.mxu1 %v5351_v24  ;;  %4243 = vmatprep.mubr.msk.f32.mxu1 %vm5142_vm0, %v5143_v1 }
  0x8e   :  { %4678 = vmatprep.subr.bf16.mxu1 %v5141_v0 }
  0x91   :  { %4680 = vmatpush3.bf16.msra.mxu1 %v5368_v29 }
  0x92   :  { %4681 = vmatprep.subr.bf16.mxu1 %v5141_v0 }
 0x137   :  { %v4181_v47 = vpop.f32.mrb[0].mxu1 }
 0x138   :  { %v5452_v48 = vadd.f32 %v4181_v47, %v3896_v46  ;;  %v346_v49 = vpop.f32.mrb[1].mxu1 }
 0x139   :  { %v392_v8 = vadd.f32 %v3896_v46, %v346_v49 }
 0x13b   :  { %v4184_v50 = vpop.f32.mrb[2].mxu1 }
 0x13c   :  { %v5454_v51 = vadd.f32 %v4184_v50, %v3896_v46  ;;  %v356_v52 = vpop.f32.mrb[3].mxu1 }
 0x13d   :  { %v5456_v53 = vadd.f32 %v3896_v46, %v356_v52 }
 0x13f   :  { %v4187_v54 = vpop.f32.mrb[4].mxu1 }
 0x140   :  { %v5458_v55 = vadd.f32 %v4187_v54, %v3896_v46  ;;  %v366_v56 = vpop.f32.mrb[5].mxu1 }
 0x141   :  { %v5460_v57 = vadd.f32 %v3896_v46, %v366_v56 }
 0x143   :  { %v4190_v58 = vpop.f32.mrb[6].mxu1 }
 0x144   :  { %v5462_v59 = vadd.f32 %v4190_v58, %v3896_v46  ;;  %v376_v60 = vpop.f32.mrb[7].mxu1 }
 0x145   :  { %v5464_v61 = vadd.f32 %v3896_v46, %v376_v60 }
 0x147   :  { %v486_v62 = vpop.f32.mrb[8].mxu1 }
 0x148   :  { %v4201_v63 = vpop.f32.mrb[9].mxu1  ;;  %v490_v12 = vadd.f32 %v486_v62, %v392_v8 }
 0x14a   :  { %v491_v14 = vmul.f32 0.5, %v490_v12 }
 0x14f   :  { %v561_v2 = vpop.f32.mrb[10].mxu1 }
 0x150   :  { %566 = vrot.lane.b32.xlu1 %v561_v2, %s5144_s10  ;;  %v4212_v3 = vpop.f32.mrb[11].mxu1 }
 0x157   :  { %v640_v4 = vpop.f32.mrb[12].mxu1 }
 0x158   :  { %645 = vrot.lane.b32.xlu0 %v640_v4, %s5145_s23  ;;  %v4223_v5 = vpop.f32.mrb[13].mxu1 }
 0x15f   :  { %v716_v6 = vpop.f32.mrb[14].mxu1 }
 0x160   :  { %v4234_v7 = vpop.f32.mrb[15].mxu1 }
 0x1c2   :  { %v567_v21 = vpop.permute.xlu1 %566 }
 0x1c3   :  { %v569_v22 = vadd.f32 %v567_v21, %v392_v8 }
 0x1c5   :  { %v570_v23 = vmul.f32 0.5, %v569_v22 }
 0x1ca   :  { %v646_v9 = vpop.permute.xlu0 %645 }
 0x1cb   :  { %v648_v10 = vadd.f32 %v646_v9, %v392_v8 }
 0x1cd   :  { %4937 = vtanh.f32 %v648_v10 }
 0x1ce   :  { %4939 = vtanh.f32 %v491_v14 }
 0x1cf   :  { %4941 = vtanh.f32 %v570_v23 }
 0x1d7   :  { %v4938_v11 = vpop.eup %4937 }
 0x1d8   :  { %731 = vrot.lane.b32.xlu0 %v4938_v11, %s5145_s23  ;;  %v4940_v15 = vpop.eup %4939 }
 0x1d9   :  { %v493_v16 = vmul.f32 0.5, %v4940_v15  ;;  %v4942_v25 = vpop.eup %4941 }
 0x1da   :  { %v572_v26 = vmul.f32 0.5, %v4942_v25 }
 0x1db   :  { %v494_v17 = vadd.f32 0.5, %v493_v16 }
 0x1dc   :  { %721 = vrot.lane.b32.xlu0 %v716_v6, %s5146_s6  ;;  %v573_v27 = vadd.f32 0.5, %v572_v26 }
 0x1de   :  { %v729_v28 = vmul.f32 0.0, %v573_v27 }
 0x24a   :  { %v732_v19 = vpop.permute.xlu0 %731 }
 0x24b   :  { %v734_v20 = vmul.f32 %v732_v19, %v494_v17 }
 0x24d   :  { %736 = vrot.lane.b32.xlu1 %v734_v20, %s5144_s10 }
 0x24e   :  { %v722_v33 = vpop.permute.xlu0 %721 }
 0x24f   :  { %v724_v34 = vadd.f32 %v722_v33, %v392_v8 }
 0x251   :  { %v725_v35 = vmul.f32 0.5, %v724_v34 }
 0x2bf   :  { %v737_v30 = vpop.permute.xlu1 %736 }
 0x2c0   :  { %v5471_v31 = vadd.f32 %v737_v30, %v729_v28 }
 0x2c2   :  { %4943 = vtanh.f32 %v5471_v31 }
 0x2c3   :  { %4945 = vtanh.f32 %v725_v35 }
 0x2cc   :  { %v4944_v32 = vpop.eup %4943 }
 0x2cd   :  { %742 = vrot.lane.b32.xlu1 %v4944_v32, %s5145_s23  ;;  %v4946_v37 = vpop.eup %4945 }
 0x2ce   :  { %v727_v38 = vmul.f32 0.5, %v4946_v37 }
 0x2d0   :  { %v728_v40 = vadd.f32 0.5, %v727_v38 }
 0x33f   :  { %v743_v41 = vpop.permute.xlu1 %742 }
 0x340   :  { %v745_v43 = vmul.f32 %v743_v41, %v728_v40 }
 0x342   :  { %747 = vrot.lane.b32.xlu0 %v745_v43, %s5144_s10 }
 0x3b4   :  { %v748_v44 = vpop.permute.xlu0 %747 }
 0x3b5   :  { %4244 = vmatmul.mubr.msk.f32.vlgmr.msra.gmra.mrb[16].mxu1 %vm416_vm4, %v748_v44  ;;  %4266 = vmatmul.mubr.msk.f32.vlgmr.msra.gmra.mrb[0].mxu0 %vm416_vm4, %v748_v44 }
 0x3b6   :  { %4683 = vmatpush3.bf16.msra.mxu1 %v5398_v36  ;;  %4254 = vmatprep.mubr.msk.f32.mxu1 %vm5142_vm0, %v5143_v1 }
 0x3b7   :  { %4684 = vmatprep.subr.bf16.mxu1 %v5141_v0  ;;  %4701 = vmatpush3.bf16.msra.mxu0 %v5351_v24 }
 0x3b8   :  { %4702 = vmatprep.subr.bf16.mxu0 %v5141_v0  ;;  %4287 = vmatprep.mubr.msk.f32.mxu0 %vm5142_vm0, %v5143_v1 }
 0x3ba   :  { %4686 = vmatpush3.bf16.msra.mxu1 %v5408_v39 }
 0x3bb   :  { %4693 = vmatprep.subr.bf16.mxu1 %v5141_v0  ;;  %4704 = vmatpush3.bf16.msra.mxu0 %v5368_v29 }
 0x3bc   :  { %4711 = vmatprep.subr.bf16.mxu0 %v5141_v0 }
 0x3bd   :  { %4255 = vmatmul.mubr.msk.f32.vlgmr.msra.gmra.mrb[18].mxu1 %vm416_vm4, %v748_v44 }
 0x3be   :  { %4695 = vmatpush3.bf16.msra.mxu1 %v5427_v42  ;;  %4276 = vmatprep.mubr.msk.f32.mxu1 %vm5142_vm0, %v5143_v1 }
 0x3bf   :  { %4696 = vmatprep.subr.bf16.mxu1 %v5141_v0 }
 0x3c2   :  { %4698 = vmatpush3.bf16.msra.mxu1 %v5438_v45 }
 0x3c3   :  { %4705 = vmatprep.subr.bf16.mxu1 %v5141_v0 }
 0x3c5   :  { %4277 = vmatmul.mubr.msk.f32.vlgmr.msra.gmra.mrb[20].mxu1 %vm416_vm4, %v748_v44 }
 0x3c6   :  { %4707 = vmatpush3.bf16.msra.mxu1 %v5398_v36  ;;  %4298 = vmatprep.mubr.msk.f32.mxu1 %vm5142_vm0, %v5143_v1 }
 0x3c7   :  { %4708 = vmatprep.subr.bf16.mxu1 %v5141_v0 }
 0x3ca   :  { %4710 = vmatpush3.bf16.msra.mxu1 %v5408_v39 }
 0x3cb   :  { %4717 = vmatprep.subr.bf16.mxu1 %v5141_v0 }
 0x488   :  { %v817_v46 = vpop.f32.mrb[16].mxu1  ;;  %v971_v47 = vpop.f32.mrb[0].mxu0 }
 0x489   :  { %976 = vrot.lane.b32.xlu1 %v971_v47, %s5145_s23  ;;  %v4245_v49 = vpop.f32.mrb[17].mxu1  ;;  %v4267_v50 = vpop.f32.mrb[1].mxu0  ;;  %v821_v2 = vadd.f32 %v817_v46, %v5452_v48 }
 0x48b   :  { %v822_v3 = vmul.f32 0.5, %v821_v2 }
 0x490   :  { %v892_v52 = vpop.f32.mrb[18].mxu1 }
 0x491   :  { %897 = vrot.lane.b32.xlu1 %v892_v52, %s5144_s10  ;;  %v4256_v54 = vpop.f32.mrb[19].mxu1 }
 0x498   :  { %v1047_v56 = vpop.f32.mrb[20].mxu1 }
 0x499   :  { %1052 = vrot.lane.b32.xlu1 %v1047_v56, %s5146_s6  ;;  %v4278_v58 = vpop.f32.mrb[21].mxu1 }
 0x4fb   :  { %v977_v60 = vpop.permute.xlu1 %976 }
 0x4fc   :  { %v979_v62 = vadd.f32 %v977_v60, %v5452_v48 }
 0x4fe   :  { %4947 = vtanh.f32 %v979_v62 }
 0x4ff   :  { %4949 = vtanh.f32 %v822_v3 }
 0x503   :  { %v898_v9 = vpop.permute.xlu1 %897 }
 0x504   :  { %v900_v10 = vadd.f32 %v898_v9, %v5452_v48 }
 0x506   :  { %v901_v11 = vmul.f32 0.5, %v900_v10 }
 0x508   :  { %v4948_v63 = vpop.eup %4947  ;;  %4951 = vtanh.f32 %v901_v11 }
 0x509   :  { %1062 = vrot.lane.b32.xlu0 %v4948_v63, %s5145_s23  ;;  %v4950_v4 = vpop.eup %4949 }
 0x50a   :  { %v824_v5 = vmul.f32 0.5, %v4950_v4 }
 0x50b   :  { %v1053_v21 = vpop.permute.xlu1 %1052 }
 0x50c   :  { %v825_v6 = vadd.f32 0.5, %v824_v5  ;;  %v1055_v22 = vadd.f32 %v1053_v21, %v5452_v48 }
 0x50e   :  { %v1056_v23 = vmul.f32 0.5, %v1055_v22 }
 0x512   :  { %v4952_v12 = vpop.eup %4951 }
 0x513   :  { %v903_v14 = vmul.f32 0.5, %v4952_v12 }
 0x515   :  { %v904_v15 = vadd.f32 0.5, %v903_v14 }
 0x517   :  { %v1060_v16 = vmul.f32 %v904_v15, %v5471_v31 }
 0x57b   :  { %v1063_v7 = vpop.permute.xlu0 %1062 }
 0x57c   :  { %v1065_v8 = vmul.f32 %v1063_v7, %v825_v6 }
 0x57e   :  { %1067 = vrot.lane.b32.xlu0 %v1065_v8, %s5144_s10 }
 0x5f0   :  { %v1068_v17 = vpop.permute.xlu0 %1067 }
 0x5f1   :  { %v5513_v19 = vadd.f32 %v1068_v17, %v1060_v16 }
 0x5f3   :  { %4953 = vtanh.f32 %v5513_v19 }
 0x5f4   :  { %4955 = vtanh.f32 %v1056_v23 }
 0x5fd   :  { %v4954_v20 = vpop.eup %4953 }
 0x5fe   :  { %1073 = vrot.lane.b32.xlu0 %v4954_v20, %s5145_s23  ;;  %v4956_v25 = vpop.eup %4955 }
 0x5ff   :  { %v1058_v26 = vmul.f32 0.5, %v4956_v25 }
 0x601   :  { %v1059_v27 = vadd.f32 0.5, %v1058_v26 }
 0x670   :  { %v1074_v28 = vpop.permute.xlu0 %1073 }
 0x671   :  { %v1076_v30 = vmul.f32 %v1074_v28, %v1059_v27 }
 0x673   :  { %1078 = vrot.lane.b32.xlu1 %v1076_v30, %s5144_s10 }
 0x6e5   :  { %v1079_v31 = vpop.permute.xlu1 %1078 }
 0x6e6   :  { %4288 = vmatmul.mubr.msk.f32.vlgmr.msra.gmra.mrb[2].mxu0 %vm416_vm4, %v1079_v31  ;;  %4299 = vmatmul.mubr.msk.f32.vlgmr.msra.gmra.mrb[22].mxu1 %vm416_vm4, %v1079_v31 }
 0x6e7   :  { %4713 = vmatpush3.bf16.msra.mxu0 %v5310_v13  ;;  %4719 = vmatpush3.bf16.msra.mxu1 %v5427_v42 }
 0x6e8   :  { %4714 = vmatprep.subr.bf16.mxu0 %v5141_v0  ;;  %4720 = vmatprep.subr.bf16.mxu1 %v5141_v0 }
 0x6e9   :  { %4309 = vmatprep.mubr.msk.f32.mxu0 %vm5142_vm0, %v5143_v1  ;;  %4320 = vmatprep.mubr.msk.f32.mxu1 %vm5142_vm0, %v5143_v1 }
 0x6eb   :  { %4716 = vmatpush3.bf16.msra.mxu0 %v5328_v18  ;;  %4722 = vmatpush3.bf16.msra.mxu1 %v5438_v45 }
 0x6ec   :  { %4723 = vmatprep.subr.bf16.mxu0 %v5141_v0  ;;  %4729 = vmatprep.subr.bf16.mxu1 %v5141_v0 }
 0x6ee   :  { %4310 = vmatmul.mubr.msk.f32.vlgmr.msra.gmra.mrb[4].mxu0 %vm416_vm4, %v1079_v31  ;;  %4321 = vmatmul.mubr.msk.f32.vlgmr.msra.gmra.mrb[24].mxu1 %vm416_vm4, %v1079_v31 }
 0x6ef   :  { %4725 = vmatpush3.bf16.msra.mxu0 %v5351_v24  ;;  %4731 = vmatpush3.bf16.msra.mxu1 %v5398_v36 }
 0x6f0   :  { %4726 = vmatprep.subr.bf16.mxu0 %v5141_v0  ;;  %4732 = vmatprep.subr.bf16.mxu1 %v5141_v0 }
 0x6f1   :  { %4331 = vmatprep.mubr.msk.f32.mxu0 %vm5142_vm0, %v5143_v1  ;;  %4342 = vmatprep.mubr.msk.f32.mxu1 %vm5142_vm0, %v5143_v1 }
 0x6f3   :  { %4728 = vmatpush3.bf16.msra.mxu0 %v5368_v29  ;;  %4734 = vmatpush3.bf16.msra.mxu1 %v5408_v39 }
 0x6f4   :  { %4735 = vmatprep.subr.bf16.mxu0 %v5141_v0  ;;  %4741 = vmatprep.subr.bf16.mxu1 %v5141_v0 }
 0x7b9   :  { %v1148_v48 = vpop.f32.mrb[2].mxu0  ;;  %v1223_v32 = vpop.f32.mrb[22].mxu1 }
 0x7ba   :  { %v4289_v33 = vpop.f32.mrb[3].mxu0  ;;  %v4300_v34 = vpop.f32.mrb[23].mxu1  ;;  %v1152_v46 = vadd.f32 %v1148_v48, %v5456_v53 }
 0x7bc   :  { %v1153_v47 = vmul.f32 0.5, %v1152_v46 }
 0x7c1   :  { %v1302_v35 = vpop.f32.mrb[4].mxu0  ;;  %v1378_v37 = vpop.f32.mrb[24].mxu1 }
 0x7c2   :  { %1307 = vrot.lane.b32.xlu0 %v1302_v35, %s5145_s23  ;;  %v4311_v38 = vpop.f32.mrb[5].mxu0  ;;  %v4322_v40 = vpop.f32.mrb[25].mxu1 }
 0x7c6   :  { %1228 = vrot.lane.b32.xlu0 %v1223_v32, %s5144_s10 }
 0x7ca   :  { %1383 = vrot.lane.b32.xlu0 %v1378_v37, %s5146_s6 }
 0x834   :  { %v1308_v41 = vpop.permute.xlu0 %1307 }
 0x835   :  { %v1310_v43 = vadd.f32 %v1308_v41, %v5456_v53 }
 0x837   :  { %4957 = vtanh.f32 %v1310_v43 }
 0x838   :  { %4959 = vtanh.f32 %v1153_v47  ;;  %v1229_v58 = vpop.permute.xlu0 %1228 }
 0x839   :  { %v1231_v60 = vadd.f32 %v1229_v58, %v5456_v53 }
 0x83b   :  { %v1232_v62 = vmul.f32 0.5, %v1231_v60 }
 0x83c   :  { %v1384_v8 = vpop.permute.xlu0 %1383 }
 0x83d   :  { %4961 = vtanh.f32 %v1232_v62  ;;  %v1386_v9 = vadd.f32 %v1384_v8, %v5456_v53 }
 0x83f   :  { %v1387_v10 = vmul.f32 0.5, %v1386_v9 }
 0x841   :  { %v4958_v44 = vpop.eup %4957 }
 0x842   :  { %1393 = vrot.lane.b32.xlu1 %v4958_v44, %s5145_s23  ;;  %v4960_v49 = vpop.eup %4959 }
 0x843   :  { %v1155_v50 = vmul.f32 0.5, %v4960_v49 }
 0x845   :  { %v1156_v52 = vadd.f32 0.5, %v1155_v50 }
 0x847   :  { %v4962_v63 = vpop.eup %4961 }
 0x848   :  { %v1234_v2 = vmul.f32 0.5, %v4962_v63 }
 0x84a   :  { %v1235_v3 = vadd.f32 0.5, %v1234_v2 }
 0x84c   :  { %v1391_v4 = vmul.f32 %v1235_v3, %v5513_v19 }
 0x8b4   :  { %v1394_v54 = vpop.permute.xlu1 %1393 }
 0x8b5   :  { %v1396_v56 = vmul.f32 %v1394_v54, %v1156_v52 }
 0x8b7   :  { %1398 = vrot.lane.b32.xlu1 %v1396_v56, %s5144_s10 }
 0x929   :  { %v1399_v5 = vpop.permute.xlu1 %1398 }
 0x92a   :  { %v5556_v6 = vadd.f32 %v1399_v5, %v1391_v4 }
 0x92c   :  { %4963 = vtanh.f32 %v5556_v6 }
 0x92d   :  { %4965 = vtanh.f32 %v1387_v10 }
 0x936   :  { %v4964_v7 = vpop.eup %4963 }
 0x937   :  { %1404 = vrot.lane.b32.xlu1 %v4964_v7, %s5145_s23  ;;  %v4966_v11 = vpop.eup %4965 }
 0x938   :  { %v1389_v12 = vmul.f32 0.5, %v4966_v11 }
 0x93a   :  { %v1390_v14 = vadd.f32 0.5, %v1389_v12 }
 0x9a9   :  { %v1405_v15 = vpop.permute.xlu1 %1404 }
 0x9aa   :  { %v1407_v16 = vmul.f32 %v1405_v15, %v1390_v14 }
 0x9ac   :  { %1409 = vrot.lane.b32.xlu0 %v1407_v16, %s5144_s10 }
 0xa1e   :  { %v1410_v17 = vpop.permute.xlu0 %1409 }
 0xa1f   :  { %4332 = vmatmul.mubr.msk.f32.vlgmr.msra.gmra.mrb[6].mxu0 %vm416_vm4, %v1410_v17  ;;  %4343 = vmatmul.mubr.msk.f32.vlgmr.msra.gmra.mrb[26].mxu1 %vm416_vm4, %v1410_v17 }
 0xa20   :  { %4737 = vmatpush3.bf16.msra.mxu0 %v5310_v13  ;;  %4743 = vmatpush3.bf16.msra.mxu1 %v5427_v42 }
 0xa21   :  { %4738 = vmatprep.subr.bf16.mxu0 %v5141_v0  ;;  %4744 = vmatprep.subr.bf16.mxu1 %v5141_v0 }
 0xa22   :  { %4353 = vmatprep.mubr.msk.f32.mxu0 %vm5142_vm0, %v5143_v1  ;;  %4364 = vmatprep.mubr.msk.f32.mxu1 %vm5142_vm0, %v5143_v1 }
 0xa24   :  { %4740 = vmatpush3.bf16.msra.mxu0 %v5328_v18  ;;  %4746 = vmatpush3.bf16.msra.mxu1 %v5438_v45 }
 0xa25   :  { %4747 = vmatprep.subr.bf16.mxu0 %v5141_v0  ;;  %4753 = vmatprep.subr.bf16.mxu1 %v5141_v0 }
 0xa27   :  { %4354 = vmatmul.mubr.msk.f32.vlgmr.msra.gmra.mrb[8].mxu0 %vm416_vm4, %v1410_v17  ;;  %4365 = vmatmul.mubr.msk.f32.vlgmr.msra.gmra.mrb[28].mxu1 %vm416_vm4, %v1410_v17 }
 0xa28   :  { %4749 = vmatpush3.bf16.msra.mxu0 %v5351_v24  ;;  %4755 = vmatpush3.bf16.msra.mxu1 %v5398_v36 }
 0xa29   :  { %4750 = vmatprep.subr.bf16.mxu0 %v5141_v0  ;;  %4756 = vmatprep.subr.bf16.mxu1 %v5141_v0 }
 0xa2a   :  { %4375 = vmatprep.mubr.msk.f32.mxu0 %vm5142_vm0, %v5143_v1  ;;  %4386 = vmatprep.mubr.msk.f32.mxu1 %vm5142_vm0, %v5143_v1 }
 0xa2c   :  { %4752 = vmatpush3.bf16.msra.mxu0 %v5368_v29  ;;  %4758 = vmatpush3.bf16.msra.mxu1 %v5408_v39 }
 0xa2d   :  { %4759 = vmatprep.subr.bf16.mxu0 %v5141_v0  ;;  %4765 = vmatprep.subr.bf16.mxu1 %v5141_v0 }
 0xaf2   :  { %v1479_v53 = vpop.f32.mrb[6].mxu0  ;;  %v1554_v19 = vpop.f32.mrb[26].mxu1 }
 0xaf3   :  { %v4333_v20 = vpop.f32.mrb[7].mxu0  ;;  %v4344_v21 = vpop.f32.mrb[27].mxu1  ;;  %v1483_v31 = vadd.f32 %v1479_v53, %v5454_v51 }
 0xaf5   :  { %v1484_v48 = vmul.f32 0.5, %v1483_v31 }
 0xafa   :  { %v1633_v22 = vpop.f32.mrb[8].mxu0  ;;  %v1709_v23 = vpop.f32.mrb[28].mxu1 }
 0xafb   :  { %1638 = vrot.lane.b32.xlu1 %v1633_v22, %s5145_s23  ;;  %v4355_v25 = vpop.f32.mrb[9].mxu0  ;;  %v4366_v26 = vpop.f32.mrb[29].mxu1 }
 0xaff   :  { %1559 = vrot.lane.b32.xlu1 %v1554_v19, %s5144_s10 }
 0xb03   :  { %1714 = vrot.lane.b32.xlu1 %v1709_v23, %s5146_s6 }
 0xb6d   :  { %v1639_v27 = vpop.permute.xlu1 %1638 }
 0xb6e   :  { %v1641_v28 = vadd.f32 %v1639_v27, %v5454_v51 }
 0xb70   :  { %4967 = vtanh.f32 %v1641_v28 }
 0xb71   :  { %4969 = vtanh.f32 %v1484_v48  ;;  %v1560_v38 = vpop.permute.xlu1 %1559 }
 0xb72   :  { %v1562_v40 = vadd.f32 %v1560_v38, %v5454_v51 }
 0xb74   :  { %v1563_v41 = vmul.f32 0.5, %v1562_v40 }
 0xb75   :  { %v1715_v54 = vpop.permute.xlu1 %1714 }
 0xb76   :  { %4971 = vtanh.f32 %v1563_v41  ;;  %v1717_v56 = vadd.f32 %v1715_v54, %v5454_v51 }
 0xb78   :  { %v1718_v58 = vmul.f32 0.5, %v1717_v56 }
 0xb7a   :  { %v4968_v30 = vpop.eup %4967 }
 0xb7b   :  { %1724 = vrot.lane.b32.xlu0 %v4968_v30, %s5145_s23  ;;  %v4970_v32 = vpop.eup %4969 }
 0xb7c   :  { %v1486_v33 = vmul.f32 0.5, %v4970_v32 }
 0xb7e   :  { %v1487_v34 = vadd.f32 0.5, %v1486_v33 }
 0xb80   :  { %v4972_v43 = vpop.eup %4971 }
 0xb81   :  { %v1565_v44 = vmul.f32 0.5, %v4972_v43 }
 0xb83   :  { %v1566_v46 = vadd.f32 0.5, %v1565_v44 }
 0xb85   :  { %v1722_v47 = vmul.f32 %v1566_v46, %v5556_v6 }
 0xbed   :  { %v1725_v35 = vpop.permute.xlu0 %1724 }
 0xbee   :  { %v1727_v37 = vmul.f32 %v1725_v35, %v1487_v34 }
 0xbf0   :  { %1729 = vrot.lane.b32.xlu0 %v1727_v37, %s5144_s10 }
 0xc62   :  { %v1730_v49 = vpop.permute.xlu0 %1729 }
 0xc63   :  { %v5599_v50 = vadd.f32 %v1730_v49, %v1722_v47 }
 0xc65   :  { %4973 = vtanh.f32 %v5599_v50 }
 0xc66   :  { %4975 = vtanh.f32 %v1718_v58 }
 0xc6f   :  { %v4974_v52 = vpop.eup %4973 }
 0xc70   :  { %1735 = vrot.lane.b32.xlu0 %v4974_v52, %s5145_s23  ;;  %v4976_v60 = vpop.eup %4975 }
 0xc71   :  { %v1720_v62 = vmul.f32 0.5, %v4976_v60 }
 0xc73   :  { %v1721_v63 = vadd.f32 0.5, %v1720_v62 }
 0xce2   :  { %v1736_v2 = vpop.permute.xlu0 %1735 }
 0xce3   :  { %v1738_v3 = vmul.f32 %v1736_v2, %v1721_v63 }
 0xce5   :  { %1740 = vrot.lane.b32.xlu1 %v1738_v3, %s5144_s10 }
 0xd57   :  { %v1741_v4 = vpop.permute.xlu1 %1740 }
 0xd58   :  { %4376 = vmatmul.mubr.msk.f32.vlgmr.msra.gmra.mrb[10].mxu0 %vm416_vm4, %v1741_v4  ;;  %4387 = vmatmul.mubr.msk.f32.vlgmr.msra.gmra.mrb[30].mxu1 %vm416_vm4, %v1741_v4 }
 0xd59   :  { %4761 = vmatpush3.bf16.msra.mxu0 %v5310_v13  ;;  %4767 = vmatpush3.bf16.msra.mxu1 %v5427_v42 }
 0xd5a   :  { %4762 = vmatprep.subr.bf16.mxu0 %v5141_v0  ;;  %4768 = vmatprep.subr.bf16.mxu1 %v5141_v0 }
 0xd5b   :  { %4397 = vmatprep.mubr.msk.f32.mxu0 %vm5142_vm0, %v5143_v1  ;;  %4408 = vmatprep.mubr.msk.f32.mxu1 %vm5142_vm0, %v5143_v1 }
 0xd5d   :  { %4764 = vmatpush3.bf16.msra.mxu0 %v5328_v18  ;;  %4770 = vmatpush3.bf16.msra.mxu1 %v5438_v45 }
 0xd5e   :  { %4771 = vmatprep.subr.bf16.mxu0 %v5141_v0  ;;  %4777 = vmatprep.subr.bf16.mxu1 %v5141_v0 }
 0xd60   :  { %4398 = vmatmul.mubr.msk.f32.vlgmr.msra.gmra.mrb[12].mxu0 %vm416_vm4, %v1741_v4  ;;  %4409 = vmatmul.mubr.msk.f32.vlgmr.msra.gmra.mrb[32].mxu1 %vm416_vm4, %v1741_v4 }
 0xd61   :  { %4773 = vmatpush3.bf16.msra.mxu0 %v5351_v24  ;;  %4779 = vmatpush3.bf16.msra.mxu1 %v5398_v36 }
 0xd62   :  { %4774 = vmatprep.subr.bf16.mxu0 %v5141_v0  ;;  %4780 = vmatprep.subr.bf16.mxu1 %v5141_v0 }
 0xd63   :  { %4419 = vmatprep.mubr.msk.f32.mxu0 %vm5142_vm0, %v5143_v1  ;;  %4430 = vmatprep.mubr.msk.f32.mxu1 %vm5142_vm0, %v5143_v1 }
 0xd65   :  { %4776 = vmatpush3.bf16.msra.mxu0 %v5368_v29  ;;  %4782 = vmatpush3.bf16.msra.mxu1 %v5408_v39 }
 0xd66   :  { %4783 = vmatprep.subr.bf16.mxu0 %v5141_v0  ;;  %4789 = vmatprep.subr.bf16.mxu1 %v5141_v0 }
 0xe2b   :  { %v1810_v51 = vpop.f32.mrb[10].mxu0  ;;  %v1885_v5 = vpop.f32.mrb[30].mxu1 }
 0xe2c   :  { %v4377_v6 = vpop.f32.mrb[11].mxu0  ;;  %v4388_v7 = vpop.f32.mrb[31].mxu1  ;;  %v1814_v16 = vadd.f32 %v1810_v51, %v5460_v57 }
 0xe2e   :  { %v1815_v17 = vmul.f32 0.5, %v1814_v16 }
 0xe33   :  { %v1964_v8 = vpop.f32.mrb[12].mxu0  ;;  %v2040_v9 = vpop.f32.mrb[32].mxu1 }
 0xe34   :  { %1969 = vrot.lane.b32.xlu0 %v1964_v8, %s5145_s23  ;;  %v4399_v10 = vpop.f32.mrb[13].mxu0  ;;  %v4410_v11 = vpop.f32.mrb[33].mxu1 }
 0xe38   :  { %1890 = vrot.lane.b32.xlu0 %v1885_v5, %s5144_s10 }
 0xe3c   :  { %2045 = vrot.lane.b32.xlu0 %v2040_v9, %s5146_s6 }
 0xea6   :  { %v1970_v12 = vpop.permute.xlu0 %1969 }
 0xea7   :  { %v1972_v14 = vadd.f32 %v1970_v12, %v5460_v57 }
 0xea9   :  { %4977 = vtanh.f32 %v1972_v14 }
 0xeaa   :  { %4979 = vtanh.f32 %v1815_v17  ;;  %v1891_v23 = vpop.permute.xlu0 %1890 }
 0xeab   :  { %v1893_v25 = vadd.f32 %v1891_v23, %v5460_v57 }
 0xead   :  { %v1894_v26 = vmul.f32 0.5, %v1893_v25 }
 0xeae   :  { %v2046_v34 = vpop.permute.xlu0 %2045 }
 0xeaf   :  { %4981 = vtanh.f32 %v1894_v26  ;;  %v2048_v35 = vadd.f32 %v2046_v34, %v5460_v57 }
 0xeb1   :  { %v2049_v37 = vmul.f32 0.5, %v2048_v35 }
 0xeb3   :  { %v4978_v15 = vpop.eup %4977 }
 0xeb4   :  { %2055 = vrot.lane.b32.xlu1 %v4978_v15, %s5145_s23  ;;  %v4980_v53 = vpop.eup %4979 }
 0xeb5   :  { %v1817_v19 = vmul.f32 0.5, %v4980_v53 }
 0xeb7   :  { %v1818_v20 = vadd.f32 0.5, %v1817_v19 }
 0xeb9   :  { %v4982_v27 = vpop.eup %4981 }
 0xeba   :  { %v1896_v28 = vmul.f32 0.5, %v4982_v27 }
 0xebc   :  { %v1897_v30 = vadd.f32 0.5, %v1896_v28 }
 0xebe   :  { %v2053_v31 = vmul.f32 %v1897_v30, %v5599_v50 }
 0xf26   :  { %v2056_v21 = vpop.permute.xlu1 %2055 }
 0xf27   :  { %v2058_v22 = vmul.f32 %v2056_v21, %v1818_v20 }
 0xf29   :  { %2060 = vrot.lane.b32.xlu1 %v2058_v22, %s5144_s10 }
 0xf9b   :  { %v2061_v48 = vpop.permute.xlu1 %2060 }
 0xf9c   :  { %v5642_v32 = vadd.f32 %v2061_v48, %v2053_v31 }
 0xf9e   :  { %4983 = vtanh.f32 %v5642_v32 }
 0xf9f   :  { %4985 = vtanh.f32 %v2049_v37 }
 0xfa8   :  { %v4984_v33 = vpop.eup %4983 }
 0xfa9   :  { %2066 = vrot.lane.b32.xlu1 %v4984_v33, %s5145_s23  ;;  %v4986_v38 = vpop.eup %4985 }
 0xfaa   :  { %v2051_v40 = vmul.f32 0.5, %v4986_v38 }
 0xfac   :  { %v2052_v41 = vadd.f32 0.5, %v2051_v40 }
0x101b   :  { %v2067_v43 = vpop.permute.xlu1 %2066 }
0x101c   :  { %v2069_v44 = vmul.f32 %v2067_v43, %v2052_v41 }
0x101e   :  { %2071 = vrot.lane.b32.xlu0 %v2069_v44, %s5144_s10 }
0x1090   :  { %v2072_v46 = vpop.permute.xlu0 %2071 }
0x1091   :  { %4420 = vmatmul.mubr.msk.f32.vlgmr.msra.gmra.mrb[14].mxu0 %vm416_vm4, %v2072_v46  ;;  %4431 = vmatmul.mubr.msk.f32.vlgmr.msra.gmra.mrb[34].mxu1 %vm416_vm4, %v2072_v46 }
0x1092   :  { %4785 = vmatpush3.bf16.msra.mxu0 %v5310_v13  ;;  %4791 = vmatpush3.bf16.msra.mxu1 %v5427_v42 }
0x1093   :  { %4786 = vmatprep.subr.bf16.mxu0 %v5141_v0  ;;  %4792 = vmatprep.subr.bf16.mxu1 %v5141_v0 }
0x1094   :  { %4441 = vmatprep.mubr.msk.f32.mxu0 %vm5142_vm0, %v5143_v1  ;;  %4452 = vmatprep.mubr.msk.f32.mxu1 %vm5142_vm0, %v5143_v1 }
0x1096   :  { %4788 = vmatpush3.bf16.msra.mxu0 %v5328_v18  ;;  %4794 = vmatpush3.bf16.msra.mxu1 %v5438_v45 }
0x1097   :  { %4795 = vmatprep.subr.bf16.mxu0 %v5141_v0  ;;  %4801 = vmatprep.subr.bf16.mxu1 %v5141_v0 }
0x1099   :  { %4442 = vmatmul.mubr.msk.f32.vlgmr.msra.gmra.mrb[16].mxu0 %vm416_vm4, %v2072_v46  ;;  %4453 = vmatmul.mubr.msk.f32.vlgmr.msra.gmra.mrb[36].mxu1 %vm416_vm4, %v2072_v46 }
0x109a   :  { %4797 = vmatpush3.bf16.msra.mxu0 %v5351_v24  ;;  %4803 = vmatpush3.bf16.msra.mxu1 %v5398_v36 }
0x109b   :  { %4798 = vmatprep.subr.bf16.mxu0 %v5141_v0  ;;  %4804 = vmatprep.subr.bf16.mxu1 %v5141_v0 }
0x109c   :  { %4463 = vmatprep.mubr.msk.f32.mxu0 %vm5142_vm0, %v5143_v1  ;;  %4474 = vmatprep.mubr.msk.f32.mxu1 %vm5142_vm0, %v5143_v1 }
0x109e   :  { %4800 = vmatpush3.bf16.msra.mxu0 %v5368_v29  ;;  %4806 = vmatpush3.bf16.msra.mxu1 %v5408_v39 }
0x109f   :  { %4807 = vmatprep.subr.bf16.mxu0 %v5141_v0  ;;  %4813 = vmatprep.subr.bf16.mxu1 %v5141_v0 }
0x1164   :  { %v2141_v57 = vpop.f32.mrb[14].mxu0  ;;  %v2216_v47 = vpop.f32.mrb[34].mxu1 }
0x1165   :  { %v4421_v49 = vpop.f32.mrb[15].mxu0  ;;  %v4432_v50 = vpop.f32.mrb[35].mxu1  ;;  %v2145_v2 = vadd.f32 %v2141_v57, %v5458_v55 }
0x1167   :  { %v2146_v3 = vmul.f32 0.5, %v2145_v2 }
0x116c   :  { %v2295_v52 = vpop.f32.mrb[16].mxu0  ;;  %v2371_v54 = vpop.f32.mrb[36].mxu1 }
0x116d   :  { %2300 = vrot.lane.b32.xlu1 %v2295_v52, %s5145_s23  ;;  %v4443_v56 = vpop.f32.mrb[17].mxu0  ;;  %v4454_v58 = vpop.f32.mrb[37].mxu1 }
0x1171   :  { %2221 = vrot.lane.b32.xlu1 %v2216_v47, %s5144_s10 }
0x1175   :  { %2376 = vrot.lane.b32.xlu1 %v2371_v54, %s5146_s6 }
0x11df   :  { %v2301_v60 = vpop.permute.xlu1 %2300 }
0x11e0   :  { %v2303_v62 = vadd.f32 %v2301_v60, %v5458_v55 }
0x11e2   :  { %4987 = vtanh.f32 %v2303_v62 }
0x11e3   :  { %4989 = vtanh.f32 %v2146_v3  ;;  %v2222_v8 = vpop.permute.xlu1 %2221 }
0x11e4   :  { %v2224_v9 = vadd.f32 %v2222_v8, %v5458_v55 }
0x11e6   :  { %v2225_v10 = vmul.f32 0.5, %v2224_v9 }
0x11e7   :  { %v2377_v19 = vpop.permute.xlu1 %2376 }
0x11e8   :  { %4991 = vtanh.f32 %v2225_v10  ;;  %v2379_v20 = vadd.f32 %v2377_v19, %v5458_v55 }
0x11ea   :  { %v2380_v21 = vmul.f32 0.5, %v2379_v20 }
0x11ec   :  { %v4988_v63 = vpop.eup %4987 }
0x11ed   :  { %2386 = vrot.lane.b32.xlu0 %v4988_v63, %s5145_s23  ;;  %v4990_v4 = vpop.eup %4989 }
0x11ee   :  { %v2148_v51 = vmul.f32 0.5, %v4990_v4 }
0x11f0   :  { %v2149_v5 = vadd.f32 0.5, %v2148_v51 }
0x11f2   :  { %v4992_v11 = vpop.eup %4991 }
0x11f3   :  { %v2227_v12 = vmul.f32 0.5, %v4992_v11 }
0x11f5   :  { %v2228_v14 = vadd.f32 0.5, %v2227_v12 }
0x11f7   :  { %v2384_v15 = vmul.f32 %v2228_v14, %v5642_v32 }
0x125f   :  { %v2387_v6 = vpop.permute.xlu0 %2386 }
0x1260   :  { %v2389_v7 = vmul.f32 %v2387_v6, %v2149_v5 }
0x1262   :  { %2391 = vrot.lane.b32.xlu0 %v2389_v7, %s5144_s10 }
0x12d4   :  { %v2392_v16 = vpop.permute.xlu0 %2391 }
0x12d5   :  { %v5685_v17 = vadd.f32 %v2392_v16, %v2384_v15 }
0x12d7   :  { %4993 = vtanh.f32 %v5685_v17 }
0x12d8   :  { %4995 = vtanh.f32 %v2380_v21 }
0x12e1   :  { %v4994_v53 = vpop.eup %4993 }
0x12e2   :  { %2397 = vrot.lane.b32.xlu0 %v4994_v53, %s5145_s23  ;;  %v4996_v22 = vpop.eup %4995 }
0x12e3   :  { %v2382_v23 = vmul.f32 0.5, %v4996_v22 }
0x12e5   :  { %v2383_v25 = vadd.f32 0.5, %v2382_v23 }
0x1354   :  { %v2398_v26 = vpop.permute.xlu0 %2397 }
0x1355   :  { %v2400_v27 = vmul.f32 %v2398_v26, %v2383_v25 }
0x1357   :  { %2402 = vrot.lane.b32.xlu1 %v2400_v27, %s5144_s10 }
0x13c9   :  { %v2403_v28 = vpop.permute.xlu1 %2402 }
0x13ca   :  { %4464 = vmatmul.mubr.msk.f32.vlgmr.msra.gmra.mrb[18].mxu0 %vm416_vm4, %v2403_v28  ;;  %4475 = vmatmul.mubr.msk.f32.vlgmr.msra.gmra.mrb[38].mxu1 %vm416_vm4, %v2403_v28 }
0x13cb   :  { %4809 = vmatpush3.bf16.msra.mxu0 %v5310_v13  ;;  %4815 = vmatpush3.bf16.msra.mxu1 %v5427_v42 }
0x13cc   :  { %4810 = vmatprep.subr.bf16.mxu0 %v5141_v0  ;;  %4816 = vmatprep.subr.bf16.mxu1 %v5141_v0 }
0x13cd   :  { %4485 = vmatprep.mubr.msk.f32.mxu0 %vm5142_vm0, %v5143_v1  ;;  %4496 = vmatprep.mubr.msk.f32.mxu1 %vm5142_vm0, %v5143_v1 }
0x13cf   :  { %4812 = vmatpush3.bf16.msra.mxu0 %v5328_v18  ;;  %4818 = vmatpush3.bf16.msra.mxu1 %v5438_v45 }
0x13d0   :  { %4819 = vmatprep.subr.bf16.mxu0 %v5141_v0  ;;  %4825 = vmatprep.subr.bf16.mxu1 %v5141_v0 }
0x13d2   :  { %4486 = vmatmul.mubr.msk.f32.vlgmr.msra.gmra.mrb[20].mxu0 %vm416_vm4, %v2403_v28  ;;  %4497 = vmatmul.mubr.msk.f32.vlgmr.msra.gmra.mrb[40].mxu1 %vm416_vm4, %v2403_v28 }
0x13d3   :  { %4821 = vmatpush3.bf16.msra.mxu0 %v5351_v24  ;;  %4827 = vmatpush3.bf16.msra.mxu1 %v5398_v36 }
0x13d4   :  { %4822 = vmatprep.subr.bf16.mxu0 %v5141_v0  ;;  %4828 = vmatprep.subr.bf16.mxu1 %v5141_v0 }
0x13d5   :  { %4507 = vmatprep.mubr.msk.f32.mxu0 %vm5142_vm0, %v5143_v1  ;;  %4518 = vmatprep.mubr.msk.f32.mxu1 %vm5142_vm0, %v5143_v1 }
0x13d7   :  { %4824 = vmatpush3.bf16.msra.mxu0 %v5368_v29  ;;  %4830 = vmatpush3.bf16.msra.mxu1 %v5408_v39 }
0x13d8   :  { %4831 = vmatprep.subr.bf16.mxu0 %v5141_v0  ;;  %4837 = vmatprep.subr.bf16.mxu1 %v5141_v0 }
0x149d   :  { %v2472_v24 = vpop.f32.mrb[18].mxu0  ;;  %v2547_v36 = vpop.f32.mrb[38].mxu1 }
0x149e   :  { %v4465_v55 = vpop.f32.mrb[19].mxu0  ;;  %v4476_v30 = vpop.f32.mrb[39].mxu1  ;;  %v2476_v35 = vadd.f32 %v2472_v24, %v5464_v61 }
0x14a0   :  { %v2477_v37 = vmul.f32 0.5, %v2476_v35  ;;  %v3144_v35 = vld [vmem:[%s5860_s13] sm:$0xff]  ;;  %s5147_s13 = smov [#allocation10]  }
0x14a1   :  { %s3868_s0 = sshll.u32 %s5147_s13, 4  ;;  %s3869_s0 = int_to_ptr.vmem [resolvable:$true] %s3868_s0 }
0x14a2   :  { %s5105_s5 = scalar_lea.vmem %s3869_s0, 16  ;;  %s5109_s8 = scalar_lea.vmem %s3869_s0, 32 }
0x14a3   :  { %p5106_p4 = scmp.ne.s32.totalorder %s3869_s0, %s5105_s5  ;;  %p5110_p5 = scmp.lt.s32.totalorder %s3869_s0, %s3869_s0 }
0x14a4   :  { %p5111_p6 = scmp.lt.s32.totalorder %s5109_s8, %s5105_s5 }
0x14a5   :  { %v2626_v31 = vpop.f32.mrb[20].mxu0  ;;  %v2702_v48 = vpop.f32.mrb[40].mxu1 }
0x14a6   :  { %2631 = vrot.lane.b32.xlu0 %v2626_v31, %s5145_s23  ;;  %v4487_v32 = vpop.f32.mrb[21].mxu0  ;;  %v4498_v33 = vpop.f32.mrb[41].mxu1  ;;  %v3065_v31 = vld [vmem:[%s5859_s12] sm:$0xff]  ;;  %p5112_p7 = por %p5111_p6, %p5110_p5 }
0x14a7   :  { %v3067_v32 = vld [vmem:[%s5859_s12 + $0x10] sm:$0xff] }
0x14a8   :  { %p5113_p8 = pnand %p5112_p7, %p5106_p4 }
0x14aa   :  { %2552 = vrot.lane.b32.xlu0 %v2547_v36, %s5144_s10 }
0x14ae   :  { %2707 = vrot.lane.b32.xlu0 %v2702_v48, %s5146_s6  ;;  %v3066_v48 = vld [vmem:[%s5859_s12 + $0x8] sm:$0xff] }
0x14af   :  { %v4844_v33 = vpack.c.bf16 %v3066_v48, %v3065_v31  ;;  %v3623_v31 = vld [vmem:[#allocation8 + $0xb8] sm:$0xff] }
0x1518   :  { %v2632_v29 = vpop.permute.xlu0 %2631 }
0x1519   :  { %v2634_v39 = vadd.f32 %v2632_v29, %v5464_v61  ;;  %v3068_v29 = vld [vmem:[%s5859_s12 + $0x18] sm:$0xff] }
0x151b   :  { %4997 = vtanh.f32 %v2634_v39  ;;  %v4847_v39 = vpack.c.bf16 %v3068_v29, %v3067_v32  ;;  %v3701_v29 = vld [vmem:[#allocation8 + $0xc8] sm:$0xff] }
0x151c   :  { %4999 = vtanh.f32 %v2477_v37  ;;  %v2553_v46 = vpop.permute.xlu0 %2552  ;;  %v3220_v37 = vld [vmem:[#allocation8] sm:$0xff] }
0x151d   :  { %v2555_v57 = vadd.f32 %v2553_v46, %v5464_v61 }
0x151f   :  { %v2556_v47 = vmul.f32 0.5, %v2555_v57 }
0x1520   :  { %v2708_v62 = vpop.permute.xlu0 %2707 }
0x1521   :  { %5001 = vtanh.f32 %v2556_v47  ;;  %v2710_v63 = vadd.f32 %v2708_v62, %v5464_v61 }
0x1523   :  { %v2711_v2 = vmul.f32 0.5, %v2710_v63 }
0x1525   :  { %v4998_v34 = vpop.eup %4997 }
0x1526   :  { %2717 = vrot.lane.b32.xlu1 %v4998_v34, %s5145_s23  ;;  %v5000_v38 = vpop.eup %4999  ;;  %v3064_v34 = vld [vmem:[%s5849_s2] sm:$0x1] }
0x1527   :  { %v2479_v40 = vmul.f32 0.5, %v5000_v38  ;;  %v3221_v38 = vld [vmem:[#allocation8 + $0x8] sm:$0xff] }
0x1529   :  { %v2480_v41 = vadd.f32 0.5, %v2479_v40  ;;  %v3143_v40 = vld [vmem:[%s5850_s3] sm:$0x1] }
0x152b   :  { %v5002_v49 = vpop.eup %5001 }
0x152c   :  { %v2558_v50 = vmul.f32 0.5, %v5002_v49 }
0x152e   :  { %v2559_v52 = vadd.f32 0.5, %v2558_v50 }
0x1530   :  { %v2715_v54 = vmul.f32 %v2559_v52, %v5685_v17 }
0x1598   :  { %v2718_v43 = vpop.permute.xlu1 %2717 }
0x1599   :  { %v2720_v44 = vmul.f32 %v2718_v43, %v2480_v41  ;;  %v4850_v41 = vpack.c.bf16 %v3221_v38, %v3220_v37  ;;  %v3222_v43 = vld [vmem:[#allocation8 + $0x10] sm:$0xff] }
0x159b   :  { %2722 = vrot.lane.b32.xlu1 %v2720_v44, %s5144_s10  ;;  %v3223_v44 = vld [vmem:[#allocation8 + $0x18] sm:$0xff] }
0x159c   :  { %v4853_v46 = vpack.c.bf16 %v3223_v44, %v3222_v43  ;;  %v3782_v44 = vld [vmem:[#allocation8 + $0xf0] sm:$0xff] }
0x160d   :  { %v2723_v56 = vpop.permute.xlu1 %2722 }
0x160e   :  { %v2725_v58 = vadd.f32 %v2723_v56, %v2715_v54 }
0x1610   :  { %5003 = vtanh.f32 %v2725_v58 }
0x1611   :  { %5005 = vtanh.f32 %v2711_v2 }
0x161a   :  { %v5004_v60 = vpop.eup %5003 }
0x161b   :  { %2728 = vrot.lane.b32.xlu1 %v5004_v60, %s5145_s23  ;;  %v5006_v3 = vpop.eup %5005 }
0x161c   :  { %v2713_v4 = vmul.f32 0.5, %v5006_v3 }
0x161e   :  { %v2714_v51 = vadd.f32 0.5, %v2713_v4 }
0x168d   :  { %v2729_v5 = vpop.permute.xlu1 %2728 }
0x168e   :  { %v2731_v6 = vmul.f32 %v2729_v5, %v2714_v51  ;;  %v3300_v51 = vld [vmem:[#allocation8 + $0x20] sm:$0xff]  ;;  %v3301_v5 = vld [vmem:[#allocation8 + $0x28] sm:$0xff] }
0x1690   :  { %2733 = vrot.lane.b32.xlu0 %v2731_v6, %s5144_s10  ;;  %v4856_v6 = vpack.c.bf16 %v3301_v5, %v3300_v51 }
0x1702   :  { %v2734_v7 = vpop.permute.xlu0 %2733 }
0x1703   :  { %4508 = vmatmul.mubr.msk.f32.vlgmr.msra.gmra.mrb[22].mxu0 %vm416_vm4, %v2734_v7  ;;  %4519 = vmatmul.mubr.msk.f32.vlgmr.msra.gmra.mrb[42].mxu1 %vm416_vm4, %v2734_v7 }
0x1704   :  { %4833 = vmatpush3.bf16.msra.mxu0 %v5310_v13  ;;  %4839 = vmatpush3.bf16.msra.mxu1 %v5427_v42 }
0x1705   :  { %4834 = vmatprep.subr.bf16.mxu0 %v5141_v0  ;;  %4840 = vmatprep.subr.bf16.mxu1 %v5141_v0 }
0x1706   :  { %4529 = vmatprep.mubr.msk.f32.mxu0 %vm5142_vm0, %v5143_v1  ;;  %4540 = vmatprep.mubr.msk.f32.mxu1 %vm5142_vm0, %v5143_v1 }
0x1708   :  { %4836 = vmatpush3.bf16.msra.mxu0 %v5328_v18  ;;  %4842 = vmatpush3.bf16.msra.mxu1 %v5438_v45 }
0x1709   :  { %4843 = vmatprep.subr.bf16.mxu0 %v5141_v0 }
0x170b   :  { %4530 = vmatmul.mubr.msk.f32.vlgmr.msra.gmra.mrb[24].mxu0 %vm416_vm4, %v2734_v7  ;;  %4541 = vmatmul.mubr.msk.f32.vlgmr.msra.gmra.mrb[44].mxu1 %vm416_vm4, %v2734_v7  ;;  %v3302_v7 = vld [vmem:[#allocation8 + $0x30] sm:$0xff] }
0x170c   :  { %4551 = vmatprep.mubr.msk.f32.mxu0 %vm5142_vm0, %v5143_v1  ;;  %4845 = vmatpush3.bf16.msra.mxu0 %v4844_v33  ;;  %v3700_v33 = vld [vmem:[#allocation8 + $0xc0] sm:$0xff] }
0x170d   :  { %4846 = vmatprep.subr.bf16.mxu0 %v5141_v0 }
0x1710   :  { %4848 = vmatpush3.bf16.msra.mxu0 %v4847_v39  ;;  %v4886_v39 = vpack.c.bf16 %v3701_v29, %v3700_v33 }
0x1711   :  { %4554 = vmatprep.subr.mxu0 %v5143_v1 }
0x1713   :  { %4552 = vmatmul.mubr.msk.f32.vlgmr.msra.gmra.mrb[26].mxu0 %vm416_vm4, %v3064_v34  ;;  %v3702_v34 = vld [vmem:[#allocation8 + $0xd0] sm:$0xff] }
0x1714   :  { %4555 = vmatpush3.msra.mxu0 %v3144_v35  ;;  %4556 = vmatprep.mubr.msk.f32.mxu0 %vm5142_vm0, %v5143_v1  ;;  %v3703_v35 = vld [vmem:[#allocation8 + $0xd8] sm:$0xff] }
0x1715   :  { %4849 = vmatprep.subr.bf16.mxu0 %v5141_v0  ;;  %v4889_v38 = vpack.c.bf16 %v3703_v35, %v3702_v34 }
0x171b   :  { %4557 = vmatmul.mubr.msk.f32.vlgmr.msra.gmra.mrb[26].mxu0 %vm3145_vm5, %v3143_v40  ;;  %v3780_v40 = vld [vmem:[#allocation8 + $0xe0] sm:$0xff] }
0x171c   :  { %4851 = vmatpush3.bf16.msra.mxu0 %v4850_v41  ;;  %4567 = vmatprep.mubr.msk.f32.mxu0 %vm5142_vm0, %v5143_v1  ;;  %v3781_v41 = vld [vmem:[#allocation8 + $0xe8] sm:$0xff] }
0x171d   :  { %4852 = vmatprep.subr.bf16.mxu0 %v5141_v0  ;;  %v4892_v43 = vpack.c.bf16 %v3781_v41, %v3780_v40 }
0x1720   :  { %4854 = vmatpush3.bf16.msra.mxu0 %v4853_v46  ;;  %v3783_v46 = vld [vmem:[#allocation8 + $0xf8] sm:$0xff] }
0x1721   :  { %4855 = vmatprep.subr.bf16.mxu0 %v5141_v0 }
0x17d6   :  { %v2803_v13 = vpop.f32.mrb[22].mxu0  ;;  %v2878_v42 = vpop.f32.mrb[42].mxu1 }
0x17d7   :  { %v4509_v61 = vpop.f32.mrb[23].mxu0  ;;  %v4520_v8 = vpop.f32.mrb[43].mxu1  ;;  %v2807_v15 = vadd.f32 %v2803_v13, %v5462_v59  ;;  %v3303_v13 = vld [vmem:[#allocation8 + $0x38] sm:$0xff] }
0x17d8   :  { %v4859_v61 = vpack.c.bf16 %v3303_v13, %v3302_v7  ;;  %v3380_v8 = vld [vmem:[#allocation8 + $0x40] sm:$0xff] }
0x17d9   :  { %v2808_v16 = vmul.f32 0.5, %v2807_v15  ;;  %v3461_v15 = vld [vmem:[#allocation8 + $0x68] sm:$0xff] }
0x17de   :  { %v2957_v9 = vpop.f32.mrb[24].mxu0  ;;  %v3033_v10 = vpop.f32.mrb[44].mxu1 }
0x17df   :  { %v4542_v11 = vpop.f32.mrb[45].mxu1  ;;  %2962 = vrot.lane.b32.xlu1 %v2957_v9, %s5145_s23  ;;  %v4531_v18 = vpop.f32.mrb[25].mxu0  ;;  %v3381_v9 = vld [vmem:[#allocation8 + $0x48] sm:$0xff] }
0x17e0   :  { %v3382_v11 = vld [vmem:[#allocation8 + $0x50] sm:$0xff]  ;;  %v3383_v18 = vld [vmem:[#allocation8 + $0x58] sm:$0xff] }
0x17e3   :  { %2883 = vrot.lane.b32.xlu1 %v2878_v42, %s5144_s10 }
0x17e7   :  { %3038 = vrot.lane.b32.xlu1 %v3033_v10, %s5146_s6  ;;  %v4862_v10 = vpack.c.bf16 %v3381_v9, %v3380_v8 }
0x1851   :  { %v2963_v45 = vpop.permute.xlu1 %2962 }
0x1852   :  { %v2965_v12 = vadd.f32 %v2963_v45, %v5462_v59 }
0x1854   :  { %5007 = vtanh.f32 %v2965_v12  ;;  %v4865_v12 = vpack.c.bf16 %v3383_v18, %v3382_v11 }
0x1855   :  { %5009 = vtanh.f32 %v2808_v16  ;;  %v2884_v22 = vpop.permute.xlu1 %2883 }
0x1856   :  { %v2886_v23 = vadd.f32 %v2884_v22, %v5462_v59  ;;  %v3541_v22 = vld [vmem:[#allocation8 + $0x88] sm:$0xff] }
0x1858   :  { %v2887_v25 = vmul.f32 0.5, %v2886_v23 }
0x1859   :  { %v3039_v57 = vpop.permute.xlu1 %3038 }
0x185a   :  { %5011 = vtanh.f32 %v2887_v25  ;;  %v3041_v47 = vadd.f32 %v3039_v57, %v5462_v59  ;;  %v3542_v25 = vld [vmem:[#allocation8 + $0x90] sm:$0xff] }
0x185c   :  { %v3042_v49 = vmul.f32 0.5, %v3041_v47  ;;  %v4895_v47 = vpack.c.bf16 %v3783_v46, %v3782_v44 }
0x185e   :  { %v5008_v14 = vpop.eup %5007 }
0x185f   :  { %3048 = vrot.lane.b32.xlu0 %v5008_v14, %s5145_s23  ;;  %v5010_v17 = vpop.eup %5009  ;;  %v3460_v14 = vld [vmem:[#allocation8 + $0x60] sm:$0xff] }
0x1860   :  { %v2810_v53 = vmul.f32 0.5, %v5010_v17  ;;  %v4868_v16 = vpack.c.bf16 %v3461_v15, %v3460_v14  ;;  %v3462_v17 = vld [vmem:[#allocation8 + $0x70] sm:$0xff] }
0x1862   :  { %v2811_v19 = vadd.f32 0.5, %v2810_v53  ;;  %v3463_v53 = vld [vmem:[#allocation8 + $0x78] sm:$0xff] }
0x1864   :  { %v5012_v26 = vpop.eup %5011 }
0x1865   :  { %v2889_v27 = vmul.f32 0.5, %v5012_v26  ;;  %v3543_v26 = vld [vmem:[#allocation8 + $0x98] sm:$0xff] }
0x1867   :  { %v2890_v28 = vadd.f32 0.5, %v2889_v27 }
0x1869   :  { %v3046_v24 = vmul.f32 %v2890_v28, %v2725_v58  ;;  %v4877_v28 = vpack.c.bf16 %v3543_v26, %v3542_v25 }
0x18d1   :  { %v3049_v20 = vpop.permute.xlu0 %3048 }
0x18d2   :  { %v3051_v21 = vmul.f32 %v3049_v20, %v2811_v19  ;;  %v4871_v20 = vpack.c.bf16 %v3463_v53, %v3462_v17 }
0x18d4   :  { %3053 = vrot.lane.b32.xlu0 %v3051_v21, %s5144_s10  ;;  %v3540_v21 = vld [vmem:[#allocation8 + $0x80] sm:$0xff] }
0x18d5   :  { %v4874_v23 = vpack.c.bf16 %v3541_v22, %v3540_v21 }
0x1946   :  { %v3054_v36 = vpop.permute.xlu0 %3053 }
0x1947   :  { %v3056_v55 = vadd.f32 %v3054_v36, %v3046_v24  ;;  %v3620_v24 = vld [vmem:[#allocation8 + $0xa0] sm:$0xff]  ;;  %v3621_v36 = vld [vmem:[#allocation8 + $0xa8] sm:$0xff] }
0x1949   :  { %5013 = vtanh.f32 %v3056_v55  ;;  %v4880_v55 = vpack.c.bf16 %v3621_v36, %v3620_v24 }
0x194a   :  { %5015 = vtanh.f32 %v3042_v49 }
0x1953   :  { %v5014_v30 = vpop.eup %5013 }
0x1954   :  { %3059 = vrot.lane.b32.xlu0 %v5014_v30, %s5145_s23  ;;  %v5016_v50 = vpop.eup %5015  ;;  %v3622_v30 = vld [vmem:[#allocation8 + $0xb0] sm:$0xff] }
0x1955   :  { %v3044_v52 = vmul.f32 0.5, %v5016_v50  ;;  %v4883_v32 = vpack.c.bf16 %v3623_v31, %v3622_v30  ;;  %v3063_v50 = vld [vmem:[%s5861_s14] sm:$0x1] }
0x1957   :  { %v3045_v54 = vadd.f32 0.5, %v3044_v52 }
0x19c6   :  { %v3060_v56 = vpop.permute.xlu0 %3059 }
0x19c7   :  { %v3062_v58 = vmul.f32 %v3060_v56, %v3045_v54 }
0x19c9   :  { %3225 = vrot.lane.b32.xlu1 %v3062_v58, %s5144_s10  ;;  %v3304_v60 = vrot.slane %v3062_v58, 1  ;;  %v3384_v62 = vrot.slane %v3062_v58, 2  ;;  %v3464_v63 = vrot.slane %v3062_v58, 3  ;;  %v3544_v2 = vrot.slane %v3062_v58, 4 }
0x19ca   :  { %v3624_v59 = vrot.slane %v3062_v58, 5  ;;  %v3704_v3 = vrot.slane %v3062_v58, 6  ;;  %v3784_v4 = vrot.slane %v3062_v58, 7 }
0x19cb   :  { %3305 = vrot.lane.b32.xlu0 %v3304_v60, %s5144_s10 }
0x19cd   :  { %3385 = vrot.lane.b32.xlu1 %v3384_v62, %s5144_s10 }
0x19cf   :  { %3465 = vrot.lane.b32.xlu0 %v3464_v63, %s5144_s10 }
0x19d1   :  { %3545 = vrot.lane.b32.xlu1 %v3544_v2, %s5144_s10 }
0x19d3   :  { %3625 = vrot.lane.b32.xlu0 %v3624_v59, %s5144_s10 }
0x19d5   :  { %3705 = vrot.lane.b32.xlu1 %v3704_v3, %s5144_s10 }
0x19d7   :  { %3785 = vrot.lane.b32.xlu0 %v3784_v4, %s5144_s10 }
0x1a3b   :  { %v3226_v42 = vpop.permute.xlu1 %3225 }
0x1a3c   :  { %4568 = vmatmul.mubr.msk.f32.vlgmr.msra.gmra.mrb[26].mxu0 %vm416_vm4, %v3226_v42 }
0x1a3d   :  { %4857 = vmatpush3.bf16.msra.mxu0 %v4856_v6  ;;  %4578 = vmatprep.mubr.msk.f32.mxu0 %vm5142_vm0, %v5143_v1  ;;  %v3306_v45 = vpop.permute.xlu0 %3305 }
0x1a3e   :  { %4858 = vmatprep.subr.bf16.mxu0 %v5141_v0 }
0x1a3f   :  { %v3386_v19 = vpop.permute.xlu1 %3385 }
0x1a41   :  { %4860 = vmatpush3.bf16.msra.mxu0 %v4859_v61  ;;  %v3466_v27 = vpop.permute.xlu0 %3465 }
0x1a42   :  { %4861 = vmatprep.subr.bf16.mxu0 %v5141_v0 }
0x1a43   :  { %v3546_v48 = vpop.permute.xlu1 %3545 }
0x1a44   :  { %4579 = vmatmul.mubr.msk.f32.vlgmr.msra.gmra.mrb[26].mxu0 %vm416_vm4, %v3306_v45 }
0x1a45   :  { %4863 = vmatpush3.bf16.msra.mxu0 %v4862_v10  ;;  %4589 = vmatprep.mubr.msk.f32.mxu0 %vm5142_vm0, %v5143_v1  ;;  %v3626_v37 = vpop.permute.xlu0 %3625 }
0x1a46   :  { %4864 = vmatprep.subr.bf16.mxu0 %v5141_v0 }
0x1a47   :  { %v3706_v57 = vpop.permute.xlu1 %3705 }
0x1a49   :  { %4866 = vmatpush3.bf16.msra.mxu0 %v4865_v12  ;;  %v3786_v49 = vpop.permute.xlu0 %3785 }
0x1a4a   :  { %4867 = vmatprep.subr.bf16.mxu0 %v5141_v0 }
0x1a4c   :  { %4590 = vmatmul.mubr.msk.f32.vlgmr.msra.gmra.mrb[26].mxu0 %vm416_vm4, %v3386_v19 }
0x1a4d   :  { %4869 = vmatpush3.bf16.msra.mxu0 %v4868_v16  ;;  %4600 = vmatprep.mubr.msk.f32.mxu0 %vm5142_vm0, %v5143_v1 }
0x1a4e   :  { %4870 = vmatprep.subr.bf16.mxu0 %v5141_v0 }
0x1a51   :  { %4872 = vmatpush3.bf16.msra.mxu0 %v4871_v20 }
0x1a52   :  { %4873 = vmatprep.subr.bf16.mxu0 %v5141_v0 }
0x1a54   :  { %4601 = vmatmul.mubr.msk.f32.vlgmr.msra.gmra.mrb[26].mxu0 %vm416_vm4, %v3466_v27 }
0x1a55   :  { %4875 = vmatpush3.bf16.msra.mxu0 %v4874_v23  ;;  %4611 = vmatprep.mubr.msk.f32.mxu0 %vm5142_vm0, %v5143_v1 }
0x1a56   :  { %4876 = vmatprep.subr.bf16.mxu0 %v5141_v0 }
0x1a59   :  { %4878 = vmatpush3.bf16.msra.mxu0 %v4877_v28 }
0x1a5a   :  { %4879 = vmatprep.subr.bf16.mxu0 %v5141_v0 }
0x1a5c   :  { %4612 = vmatmul.mubr.msk.f32.vlgmr.msra.gmra.mrb[26].mxu0 %vm416_vm4, %v3546_v48 }
0x1a5d   :  { %4881 = vmatpush3.bf16.msra.mxu0 %v4880_v55  ;;  %4622 = vmatprep.mubr.msk.f32.mxu0 %vm5142_vm0, %v5143_v1 }
0x1a5e   :  { %4882 = vmatprep.subr.bf16.mxu0 %v5141_v0 }
0x1a61   :  { %4884 = vmatpush3.bf16.msra.mxu0 %v4883_v32 }
0x1a62   :  { %4885 = vmatprep.subr.bf16.mxu0 %v5141_v0 }
0x1a64   :  { %4623 = vmatmul.mubr.msk.f32.vlgmr.msra.gmra.mrb[26].mxu0 %vm416_vm4, %v3626_v37 }
0x1a65   :  { %4887 = vmatpush3.bf16.msra.mxu0 %v4886_v39  ;;  %4633 = vmatprep.mubr.msk.f32.mxu0 %vm5142_vm0, %v5143_v1 }
0x1a66   :  { %4888 = vmatprep.subr.bf16.mxu0 %v5141_v0 }
0x1a69   :  { %4890 = vmatpush3.bf16.msra.mxu0 %v4889_v38 }
0x1a6a   :  { %4891 = vmatprep.subr.bf16.mxu0 %v5141_v0 }
0x1a6c   :  { %4634 = vmatmul.mubr.msk.f32.vlgmr.msra.gmra.mrb[26].mxu0 %vm416_vm4, %v3706_v57 }
0x1a6d   :  { %4893 = vmatpush3.bf16.msra.mxu0 %v4892_v43  ;;  %4644 = vmatprep.mubr.msk.f32.mxu0 %vm5142_vm0, %v5143_v1 }
0x1a6e   :  { %4894 = vmatprep.subr.bf16.mxu0 %v5141_v0 }
0x1a71   :  { %4896 = vmatpush3.bf16.msra.mxu0 %v4895_v47 }
0x1a74   :  { %4645 = vmatmul.mubr.msk.f32.vlgmr.msra.gmra.mrb[26].mxu0 %vm416_vm4, %v3786_v49 }
0x1b47   :  { %v3855_v52 = vpop.f32.mrb[26].mxu0 }
0x1b48   :  { %v4897_v54 = vadd.f32 %v3855_v52, %v3063_v50  ;;  %v4646_v56 = vpop.f32.mrb[27].mxu0 }
0x1b4a   :  { %v3860_v58 = vmax.f32 %v4897_v54, 0.0 }
0x1b4c   :  { %3861 = vst [vmem:[#allocation10] sm:$0x1] %v3860_v58 }
0x1b4d   :  { %5116 = shalt.err (!%p5113_p8)
}
0x1b4e   :  { %s5865_s16 = sld [smem:[#allocation15_spill]] }
0x1b54   :  { %s5117_s14 = scalar_lea.hbm %s5865_s16, 16 }
0x1b55   :  { %p5118_p9 = scmp.ne.s32.totalorder %s5865_s16, %s5117_s14  ;;  %p5121_p10 = scmp.lt.u32.totalorder %s5117_s14, %s5865_s16 }
0x1b57   :  { %p5123_p11 = pnand %p5121_p10, %p5118_p9 }
0x1b59   :  { %5126 = shalt.err (!%p5123_p11)
}
0x1b5a   :  { %3871 = dma.vmem_to_hbm [thread:$0]  %s3869_s0, 16, %s5865_s16, [#allocation4]  }
0x1b5b   :  { %5133 = dma.done.wait [#allocation4], 16  }
0x1b5c   :  { %5134 = vsyncadd [#allocation4], 4294967280 }
0x1b5d   :  { %3875 = vsyncpa [#allocation3], 1 }
0x1b5e   :  { %3876 = vsyncpa [#allocation6], 1 }
0x1b5f   :  { %3877 = vsyncpa [#allocation9], 1 }
0x1b60   :  { %3878 = vsyncpa [#allocation4], 1 }

</bundles_post_ra>
